<compile_context>
chip_gen: v7x
topology: tpu7x:2x2x1
jax: 0.10.0
libtpu: 0.0.40
codegen_flags: <defaults>
</compile_context>

<pallas_src>
import jax
import jax.numpy as jnp
from jax.experimental import pallas as pl
from jax.experimental.pallas import tpu as pltpu


def _round_up(x, m):
    return (x + m - 1) // m * m


# ----------------------------------------------------------------------------
# Single fused kernel: all LSTM layers + time loop + out2token Linear + (-exp).
# ----------------------------------------------------------------------------
def _make_syntax_lstm_kernel(nb_layers, seq_len, bp, hidden, in_dims):
    L, S, Bp, H = nb_layers, seq_len, bp, hidden

    def kernel(x_ref, wih_ref, whh_ref, b_ref, h0_ref, c0_ref,
               wout_ref, bout_ref, mask_ref, hn_ref, cn_ref):
        # Load the whole initial state once; hn/cn are aliased onto h0/c0, so
        # every later in-place write is data-dependent on this load (safe).
        h0_all = h0_ref[...]                            # (L, Bp, H) f32
        c0_all = c0_ref[...]                            # (L, Bp, H) f32

        inp = x_ref[...]                                # (S*Bp, IN0) bf16
        for l in range(L):
            in_l = in_dims[l]
            wih_l = wih_ref[l]                          # (IN_max, 4H) bf16
            if in_l != wih_l.shape[0]:
                wih_l = wih_l[:in_l, :]
            whh_l = whh_ref[l]                          # (H, 4H) bf16
            b_l = b_ref[l]                              # (1, 4H) f32

            # Hoisted input projection for the whole sequence, bias folded in.
            # bf16 MXU, f32 accumulate. M = S*Bp, N = 4H (full 128 lanes).
            xp = jnp.dot(inp, wih_l,
                         preferred_element_type=jnp.float32) + b_l

            h = h0_all[l]                               # (Bp, H) f32
            c = c0_all[l]                               # (Bp, H) f32
            ys = []
            # Fully-unrolled serial recurrence (S static, small).
            # TODO(synk): for large S switch to a time-blocked grid /
            #             fori_loop carrying h/c in scratch.
            for t in range(S):
                row = t * Bp                            # static, multiple of 8
                gates = xp[row:row + Bp, :] + jnp.dot(
                    h.astype(jnp.bfloat16), whh_l,
                    preferred_element_type=jnp.float32)  # (Bp, 4H) f32
                # Two full-width EUP pushes instead of four 32-lane ones.
                sig = jax.nn.sigmoid(gates)
                th = jnp.tanh(gates)
                i_g = sig[:, 0 * H:1 * H]
                f_g = sig[:, 1 * H:2 * H]
                g_g = th[:, 2 * H:3 * H]
                o_g = sig[:, 3 * H:4 * H]
                c = f_g * c + i_g * g_g                 # f32 state update
                h = o_g * jnp.tanh(c)
                ys.append(h)

            hn_ref[l] = h                               # in-place final state
            cn_ref[l] = c
            # Next layer's input: one (S*Bp, H) slab of values, cast to bf16
            # once — no per-step masked stores inside the serial loop.
            inp = jnp.concatenate(ys, axis=0).astype(jnp.bfloat16)

        # Fused out2token Linear + stx_mask = -exp(scores). Vp is lane-dense.
        scores = jnp.dot(inp, wout_ref[...],
                         preferred_element_type=jnp.float32) + bout_ref[...]
        mask_ref[...] = -jnp.exp(scores)

    return kernel


# ----------------------------------------------------------------------------
# Wrapper: batch-first API matching nn.LSTM(batch_first=True) + out2token.
# ----------------------------------------------------------------------------
def syntax_lstm_forward(params, inp_sequence_embedded, state):
    """inp_sequence_embedded: (batch, seq, emb); state: (h0, c0) each (L, B, H).
    Returns (stx_mask: (batch, seq, vocab), (h_n, c_n))."""
    h0, c0 = state
    L, B, H = h0.shape
    _, S, IN0 = inp_sequence_embedded.shape
    V = params["w_out"].shape[1]

    Bp = _round_up(B, 8)          # full sublane tile -> aligned static slices
    Vp = _round_up(V, 128)        # lane-dense projection output
    in_dims = tuple([IN0] + [H] * (L - 1))
    in_max = max(in_dims)

    # time-major, batch padded, flattened to a 2D slab (S*Bp, IN0), bf16.
    x_tm = jnp.transpose(inp_sequence_embedded, (1, 0, 2))        # (S, B, IN0)
    x_tm = jnp.pad(x_tm, ((0, 0), (0, Bp - B), (0, 0)))
    x2 = x_tm.reshape(S * Bp, IN0).astype(jnp.bfloat16)

    # Stacked per-layer weights: 3 inputs instead of 3*L. bf16 MXU operands.
    wih_all = jnp.stack(
        [jnp.pad(params["wih"][l], ((0, in_max - in_dims[l]), (0, 0)))
         for l in range(L)]).astype(jnp.bfloat16)                 # (L, in_max, 4H)
    whh_all = jnp.stack(params["whh"]).astype(jnp.bfloat16)       # (L, H, 4H)
    b_all = jnp.stack(params["b"])                                # (L, 1, 4H) f32

    h0p = jnp.pad(h0, ((0, 0), (0, Bp - B), (0, 0)))
    c0p = jnp.pad(c0, ((0, 0), (0, Bp - B), (0, 0)))

    w_out_p = jnp.pad(params["w_out"],
                      ((0, 0), (0, Vp - V))).astype(jnp.bfloat16)  # (H, Vp)
    b_out_p = jnp.pad(params["b_out"], (0, Vp - V)).reshape(1, Vp)  # f32

    vmem = pl.BlockSpec(memory_space=pltpu.MemorySpace.VMEM)
    kernel = _make_syntax_lstm_kernel(L, S, Bp, H, in_dims)

    mask_p, hn_p, cn_p = pl.pallas_call(
        kernel,
        out_shape=(jax.ShapeDtypeStruct((S * Bp, Vp), jnp.float32),
                   jax.ShapeDtypeStruct((L, Bp, H), jnp.float32),
                   jax.ShapeDtypeStruct((L, Bp, H), jnp.float32)),
        in_specs=[vmem] * 8,
        out_specs=(vmem, vmem, vmem),
        # h0/c0 buffers are donated to h_n/c_n (final state written in place).
        input_output_aliases={4: 1, 5: 2},
    )(x2, wih_all, whh_all, b_all, h0p, c0p, w_out_p, b_out_p)

    stx_mask = jnp.transpose(mask_p.reshape(S, Bp, Vp)[:, :B, :V], (1, 0, 2))
    return stx_mask, (hn_p[:, :B], cn_p[:, :B])


# ----------------------------------------------------------------------------
# Pure-JAX f32 reference (for correctness check). Same stacked-gate layout.
# ----------------------------------------------------------------------------
def syntax_lstm_ref(params, x_bsf, state):
    h0_all, c0_all = state
    L = h0_all.shape[0]
    H = h0_all.shape[-1]
    x = jnp.transpose(x_bsf, (1, 0, 2))          # (S, B, IN)
    hns, cns = [], []
    for l in range(L):
        wih, whh, b = params["wih"][l], params["whh"][l], params["b"][l]

        def step(carry, xt, wih=wih, whh=whh, b=b):
            h, c = carry
            g = xt @ wih + h @ whh + b
            i = jax.nn.sigmoid(g[:, 0 * H:1 * H])
            f = jax.nn.sigmoid(g[:, 1 * H:2 * H])
            gg = jnp.tanh(g[:, 2 * H:3 * H])
            o = jax.nn.sigmoid(g[:, 3 * H:4 * H])
            c = f * c + i * gg
            h = o * jnp.tanh(c)
            return (h, c), h

        (hn, cn), ys = jax.lax.scan(step, (h0_all[l], c0_all[l]), x)
        x = ys
        hns.append(hn)
        cns.append(cn)
    stx_out = jnp.transpose(x, (1, 0, 2))
    B, S, _ = stx_out.shape
    scores = stx_out.reshape(B * S, H) @ params["w_out"] + params["b_out"]
    return -jnp.exp(scores).reshape(B, S, -1), (jnp.stack(hns), jnp.stack(cns))


# ----------------------------------------------------------------------------
# Deterministic parameter init (PyTorch-style uniform ranges), gate-stacked.
# Gate column order within 4H: [i | f | g | o] (PyTorch nn.LSTM order).
# ----------------------------------------------------------------------------
def init_params(key, vocab_size, embedding_dim, hidden, nb_layers):
    k = 1.0 / jnp.sqrt(hidden)
    wih, whh, b = [], [], []
    for l in range(nb_layers):
        in_dim = embedding_dim if l == 0 else hidden
        key, k1, k2, k3, k4 = jax.random.split(key, 5)
        wih.append(jax.random.uniform(k1, (in_dim, 4 * hidden), jnp.float32, -k, k))
        whh.append(jax.random.uniform(k2, (hidden, 4 * hidden), jnp.float32, -k, k))
        b_ih = jax.random.uniform(k3, (1, 4 * hidden), jnp.float32, -k, k)
        b_hh = jax.random.uniform(k4, (1, 4 * hidden), jnp.float32, -k, k)
        b.append(b_ih + b_hh)
    key, k5, k6 = jax.random.split(key, 3)
    w_out = jax.random.uniform(k5, (hidden, vocab_size), jnp.float32, -k, k)
    b_out = jax.random.uniform(k6, (vocab_size,), jnp.float32, -k, k)
    return {"wih": wih, "whh": whh, "b": b, "w_out": w_out, "b_out": b_out}


if __name__ == "__main__":
    vocab_size = 64
    embedding_dim = 32
    hidden = 32
    nb_layers = 2
    batch, seq = 2, 8

    key = jax.random.PRNGKey(0)
    kp, kx, kh, kc = jax.random.split(key, 4)
    params = init_params(kp, vocab_size, embedding_dim, hidden, nb_layers)

    x = jax.random.normal(kx, (batch, seq, embedding_dim), jnp.float32)
    h0 = jax.random.normal(kh, (nb_layers, batch, hidden), jnp.float32)
    c0 = jax.random.normal(kc, (nb_layers, batch, hidden), jnp.float32)

    fwd = jax.jit(syntax_lstm_forward)
    stx_mask, (h_n, c_n) = fwd(params, x, (h0, c0))
    jax.block_until_ready((stx_mask, h_n, c_n))

    ref_mask, (ref_h, ref_c) = syntax_lstm_ref(params, x, (h0, c0))
    assert stx_mask.shape == (batch, seq, vocab_size)
    assert h_n.shape == (nb_layers, batch, hidden)
    assert c_n.shape == (nb_layers, batch, hidden)
    # bf16 MXU operands (f32 accumulate / f32 state & gate math) vs the pure
    # f32 reference -> loosened tolerances.
    assert jnp.allclose(stx_mask, ref_mask, rtol=5e-2, atol=5e-2)
    assert jnp.allclose(h_n, ref_h, rtol=5e-2, atol=5e-2)
    assert jnp.allclose(c_n, ref_c, rtol=5e-2, atol=5e-2)

    print("KERNEL_OK")
</pallas_src>

<mosaic_0001>
module attributes {stable_mosaic.version = 11 : i64} {
  func.func @kernel(%arg0: memref<64x32xbf16, #tpu.memory_space<vmem>>, %arg1: memref<2x32x128xbf16, #tpu.memory_space<vmem>>, %arg2: memref<2x32x128xbf16, #tpu.memory_space<vmem>>, %arg3: memref<2x1x128xf32, #tpu.memory_space<vmem>>, %arg4: memref<2x8x32xf32, #tpu.memory_space<vmem>>, %arg5: memref<2x8x32xf32, #tpu.memory_space<vmem>>, %arg6: memref<32x128xbf16, #tpu.memory_space<vmem>>, %arg7: memref<1x128xf32, #tpu.memory_space<vmem>>, %arg8: memref<64x128xf32, #tpu.memory_space<vmem>>, %arg9: memref<2x8x32xf32, #tpu.memory_space<vmem>>, %arg10: memref<2x8x32xf32, #tpu.memory_space<vmem>>) attributes {dimension_semantics = [], scalar_prefetch = 0 : i64, scratch_operands = 0 : i64, tpu.core_type = #tpu.core_type<tc>} {
    %c0 = arith.constant 0 : index
    %c0_0 = arith.constant 0 : index
    %c0_1 = arith.constant 0 : index
    %0 = vector.load %arg4[%c0, %c0_0, %c0_1] : memref<2x8x32xf32, #tpu.memory_space<vmem>>, vector<2x8x32xf32>
    %c0_2 = arith.constant 0 : index
    %c0_3 = arith.constant 0 : index
    %c0_4 = arith.constant 0 : index
    %1 = vector.load %arg5[%c0_2, %c0_3, %c0_4] : memref<2x8x32xf32, #tpu.memory_space<vmem>>, vector<2x8x32xf32>
    %c0_5 = arith.constant 0 : index
    %c0_6 = arith.constant 0 : index
    %2 = vector.load %arg0[%c0_5, %c0_6] : memref<64x32xbf16, #tpu.memory_space<vmem>>, vector<64x32xbf16>
    %c0_7 = arith.constant 0 : index
    %c0_8 = arith.constant 0 : index
    %c0_9 = arith.constant 0 : index
    %3 = vector.load %arg1[%c0_7, %c0_8, %c0_9] : memref<2x32x128xbf16, #tpu.memory_space<vmem>>, vector<1x32x128xbf16>
    %4 = vector.shape_cast %3 : vector<1x32x128xbf16> to vector<32x128xbf16>
    %c0_10 = arith.constant 0 : index
    %c0_11 = arith.constant 0 : index
    %c0_12 = arith.constant 0 : index
    %5 = vector.load %arg2[%c0_10, %c0_11, %c0_12] : memref<2x32x128xbf16, #tpu.memory_space<vmem>>, vector<1x32x128xbf16>
    %6 = vector.shape_cast %5 : vector<1x32x128xbf16> to vector<32x128xbf16>
    %c0_13 = arith.constant 0 : index
    %c0_14 = arith.constant 0 : index
    %c0_15 = arith.constant 0 : index
    %7 = vector.load %arg3[%c0_13, %c0_14, %c0_15] : memref<2x1x128xf32, #tpu.memory_space<vmem>>, vector<1x1x128xf32>
    %8 = vector.shape_cast %7 : vector<1x1x128xf32> to vector<1x128xf32>
    %cst = arith.constant dense<0.000000e+00> : vector<64x128xf32>
    %9 = tpu.matmul %2, %4, %cst {dimension_numbers = #tpu.dot_dimension_numbers<[1], [0], [0], [1], [0, 0, 1, 1], [], []>} : vector<64x32xbf16>, vector<32x128xbf16>, vector<64x128xf32> -> vector<64x128xf32>
    %10 = vector.broadcast %8 : vector<1x128xf32> to vector<64x128xf32>
    %11 = arith.addf %9, %10 : vector<64x128xf32>
    %12 = vector.extract_strided_slice %0 {offsets = [0, 0, 0], sizes = [1, 8, 32], strides = [1, 1, 1]} : vector<2x8x32xf32> to vector<1x8x32xf32>
    %13 = vector.shape_cast %12 : vector<1x8x32xf32> to vector<8x32xf32>
    %14 = vector.extract_strided_slice %1 {offsets = [0, 0, 0], sizes = [1, 8, 32], strides = [1, 1, 1]} : vector<2x8x32xf32> to vector<1x8x32xf32>
    %15 = vector.shape_cast %14 : vector<1x8x32xf32> to vector<8x32xf32>
    %16 = vector.extract_strided_slice %11 {offsets = [0, 0], sizes = [8, 128], strides = [1, 1]} : vector<64x128xf32> to vector<8x128xf32>
    %17 = arith.truncf %13 : vector<8x32xf32> to vector<8x32xbf16>
    %cst_16 = arith.constant dense<0.000000e+00> : vector<8x128xf32>
    %18 = tpu.matmul %17, %6, %cst_16 {dimension_numbers = #tpu.dot_dimension_numbers<[1], [0], [0], [1], [0, 0, 1, 1], [], []>} : vector<8x32xbf16>, vector<32x128xbf16>, vector<8x128xf32> -> vector<8x128xf32>
    %19 = arith.addf %16, %18 : vector<8x128xf32>
    %20 = arith.negf %19 : vector<8x128xf32>
    %21 = math.exp %20 : vector<8x128xf32>
    %cst_17 = arith.constant 1.000000e+00 : f32
    %22 = vector.broadcast %cst_17 : f32 to vector<8x128xf32>
    %23 = arith.addf %22, %21 : vector<8x128xf32>
    %24 = arith.divf %22, %23 : vector<8x128xf32>
    %25 = math.tanh %19 : vector<8x128xf32>
    %26 = vector.extract_strided_slice %24 {offsets = [0, 0], sizes = [8, 32], strides = [1, 1]} : vector<8x128xf32> to vector<8x32xf32>
    %27 = vector.extract_strided_slice %24 {offsets = [0, 32], sizes = [8, 32], strides = [1, 1]} : vector<8x128xf32> to vector<8x32xf32>
    %28 = vector.extract_strided_slice %25 {offsets = [0, 64], sizes = [8, 32], strides = [1, 1]} : vector<8x128xf32> to vector<8x32xf32>
    %29 = vector.extract_strided_slice %24 {offsets = [0, 96], sizes = [8, 32], strides = [1, 1]} : vector<8x128xf32> to vector<8x32xf32>
    %30 = arith.mulf %27, %15 : vector<8x32xf32>
    %31 = arith.mulf %26, %28 : vector<8x32xf32>
    %32 = arith.addf %30, %31 : vector<8x32xf32>
    %33 = math.tanh %32 : vector<8x32xf32>
    %34 = arith.mulf %29, %33 : vector<8x32xf32>
    %35 = vector.extract_strided_slice %11 {offsets = [8, 0], sizes = [8, 128], strides = [1, 1]} : vector<64x128xf32> to vector<8x128xf32>
    %36 = arith.truncf %34 : vector<8x32xf32> to vector<8x32xbf16>
    %cst_18 = arith.constant dense<0.000000e+00> : vector<8x128xf32>
    %37 = tpu.matmul %36, %6, %cst_18 {dimension_numbers = #tpu.dot_dimension_numbers<[1], [0], [0], [1], [0, 0, 1, 1], [], []>} : vector<8x32xbf16>, vector<32x128xbf16>, vector<8x128xf32> -> vector<8x128xf32>
    %38 = arith.addf %35, %37 : vector<8x128xf32>
    %39 = arith.negf %38 : vector<8x128xf32>
    %40 = math.exp %39 : vector<8x128xf32>
    %cst_19 = arith.constant 1.000000e+00 : f32
    %41 = vector.broadcast %cst_19 : f32 to vector<8x128xf32>
    %42 = arith.addf %41, %40 : vector<8x128xf32>
    %43 = arith.divf %41, %42 : vector<8x128xf32>
    %44 = math.tanh %38 : vector<8x128xf32>
    %45 = vector.extract_strided_slice %43 {offsets = [0, 0], sizes = [8, 32], strides = [1, 1]} : vector<8x128xf32> to vector<8x32xf32>
    %46 = vector.extract_strided_slice %43 {offsets = [0, 32], sizes = [8, 32], strides = [1, 1]} : vector<8x128xf32> to vector<8x32xf32>
    %47 = vector.extract_strided_slice %44 {offsets = [0, 64], sizes = [8, 32], strides = [1, 1]} : vector<8x128xf32> to vector<8x32xf32>
    %48 = vector.extract_strided_slice %43 {offsets = [0, 96], sizes = [8, 32], strides = [1, 1]} : vector<8x128xf32> to vector<8x32xf32>
    %49 = arith.mulf %46, %32 : vector<8x32xf32>
    %50 = arith.mulf %45, %47 : vector<8x32xf32>
    %51 = arith.addf %49, %50 : vector<8x32xf32>
    %52 = math.tanh %51 : vector<8x32xf32>
    %53 = arith.mulf %48, %52 : vector<8x32xf32>
    %54 = vector.extract_strided_slice %11 {offsets = [16, 0], sizes = [8, 128], strides = [1, 1]} : vector<64x128xf32> to vector<8x128xf32>
    %55 = arith.truncf %53 : vector<8x32xf32> to vector<8x32xbf16>
    %cst_20 = arith.constant dense<0.000000e+00> : vector<8x128xf32>
    %56 = tpu.matmul %55, %6, %cst_20 {dimension_numbers = #tpu.dot_dimension_numbers<[1], [0], [0], [1], [0, 0, 1, 1], [], []>} : vector<8x32xbf16>, vector<32x128xbf16>, vector<8x128xf32> -> vector<8x128xf32>
    %57 = arith.addf %54, %56 : vector<8x128xf32>
    %58 = arith.negf %57 : vector<8x128xf32>
    %59 = math.exp %58 : vector<8x128xf32>
    %cst_21 = arith.constant 1.000000e+00 : f32
    %60 = vector.broadcast %cst_21 : f32 to vector<8x128xf32>
    %61 = arith.addf %60, %59 : vector<8x128xf32>
    %62 = arith.divf %60, %61 : vector<8x128xf32>
    %63 = math.tanh %57 : vector<8x128xf32>
    %64 = vector.extract_strided_slice %62 {offsets = [0, 0], sizes = [8, 32], strides = [1, 1]} : vector<8x128xf32> to vector<8x32xf32>
    %65 = vector.extract_strided_slice %62 {offsets = [0, 32], sizes = [8, 32], strides = [1, 1]} : vector<8x128xf32> to vector<8x32xf32>
    %66 = vector.extract_strided_slice %63 {offsets = [0, 64], sizes = [8, 32], strides = [1, 1]} : vector<8x128xf32> to vector<8x32xf32>
    %67 = vector.extract_strided_slice %62 {offsets = [0, 96], sizes = [8, 32], strides = [1, 1]} : vector<8x128xf32> to vector<8x32xf32>
    %68 = arith.mulf %65, %51 : vector<8x32xf32>
    %69 = arith.mulf %64, %66 : vector<8x32xf32>
    %70 = arith.addf %68, %69 : vector<8x32xf32>
    %71 = math.tanh %70 : vector<8x32xf32>
    %72 = arith.mulf %67, %71 : vector<8x32xf32>
    %73 = vector.extract_strided_slice %11 {offsets = [24, 0], sizes = [8, 128], strides = [1, 1]} : vector<64x128xf32> to vector<8x128xf32>
    %74 = arith.truncf %72 : vector<8x32xf32> to vector<8x32xbf16>
    %cst_22 = arith.constant dense<0.000000e+00> : vector<8x128xf32>
    %75 = tpu.matmul %74, %6, %cst_22 {dimension_numbers = #tpu.dot_dimension_numbers<[1], [0], [0], [1], [0, 0, 1, 1], [], []>} : vector<8x32xbf16>, vector<32x128xbf16>, vector<8x128xf32> -> vector<8x128xf32>
    %76 = arith.addf %73, %75 : vector<8x128xf32>
    %77 = arith.negf %76 : vector<8x128xf32>
    %78 = math.exp %77 : vector<8x128xf32>
    %cst_23 = arith.constant 1.000000e+00 : f32
    %79 = vector.broadcast %cst_23 : f32 to vector<8x128xf32>
    %80 = arith.addf %79, %78 : vector<8x128xf32>
    %81 = arith.divf %79, %80 : vector<8x128xf32>
    %82 = math.tanh %76 : vector<8x128xf32>
    %83 = vector.extract_strided_slice %81 {offsets = [0, 0], sizes = [8, 32], strides = [1, 1]} : vector<8x128xf32> to vector<8x32xf32>
    %84 = vector.extract_strided_slice %81 {offsets = [0, 32], sizes = [8, 32], strides = [1, 1]} : vector<8x128xf32> to vector<8x32xf32>
    %85 = vector.extract_strided_slice %82 {offsets = [0, 64], sizes = [8, 32], strides = [1, 1]} : vector<8x128xf32> to vector<8x32xf32>
    %86 = vector.extract_strided_slice %81 {offsets = [0, 96], sizes = [8, 32], strides = [1, 1]} : vector<8x128xf32> to vector<8x32xf32>
    %87 = arith.mulf %84, %70 : vector<8x32xf32>
    %88 = arith.mulf %83, %85 : vector<8x32xf32>
    %89 = arith.addf %87, %88 : vector<8x32xf32>
    %90 = math.tanh %89 : vector<8x32xf32>
    %91 = arith.mulf %86, %90 : vector<8x32xf32>
    %92 = vector.extract_strided_slice %11 {offsets = [32, 0], sizes = [8, 128], strides = [1, 1]} : vector<64x128xf32> to vector<8x128xf32>
    %93 = arith.truncf %91 : vector<8x32xf32> to vector<8x32xbf16>
    %cst_24 = arith.constant dense<0.000000e+00> : vector<8x128xf32>
    %94 = tpu.matmul %93, %6, %cst_24 {dimension_numbers = #tpu.dot_dimension_numbers<[1], [0], [0], [1], [0, 0, 1, 1], [], []>} : vector<8x32xbf16>, vector<32x128xbf16>, vector<8x128xf32> -> vector<8x128xf32>
    %95 = arith.addf %92, %94 : vector<8x128xf32>
    %96 = arith.negf %95 : vector<8x128xf32>
    %97 = math.exp %96 : vector<8x128xf32>
    %cst_25 = arith.constant 1.000000e+00 : f32
    %98 = vector.broadcast %cst_25 : f32 to vector<8x128xf32>
    %99 = arith.addf %98, %97 : vector<8x128xf32>
    %100 = arith.divf %98, %99 : vector<8x128xf32>
    %101 = math.tanh %95 : vector<8x128xf32>
    %102 = vector.extract_strided_slice %100 {offsets = [0, 0], sizes = [8, 32], strides = [1, 1]} : vector<8x128xf32> to vector<8x32xf32>
    %103 = vector.extract_strided_slice %100 {offsets = [0, 32], sizes = [8, 32], strides = [1, 1]} : vector<8x128xf32> to vector<8x32xf32>
    %104 = vector.extract_strided_slice %101 {offsets = [0, 64], sizes = [8, 32], strides = [1, 1]} : vector<8x128xf32> to vector<8x32xf32>
    %105 = vector.extract_strided_slice %100 {offsets = [0, 96], sizes = [8, 32], strides = [1, 1]} : vector<8x128xf32> to vector<8x32xf32>
    %106 = arith.mulf %103, %89 : vector<8x32xf32>
    %107 = arith.mulf %102, %104 : vector<8x32xf32>
    %108 = arith.addf %106, %107 : vector<8x32xf32>
    %109 = math.tanh %108 : vector<8x32xf32>
    %110 = arith.mulf %105, %109 : vector<8x32xf32>
    %111 = vector.extract_strided_slice %11 {offsets = [40, 0], sizes = [8, 128], strides = [1, 1]} : vector<64x128xf32> to vector<8x128xf32>
    %112 = arith.truncf %110 : vector<8x32xf32> to vector<8x32xbf16>
    %cst_26 = arith.constant dense<0.000000e+00> : vector<8x128xf32>
    %113 = tpu.matmul %112, %6, %cst_26 {dimension_numbers = #tpu.dot_dimension_numbers<[1], [0], [0], [1], [0, 0, 1, 1], [], []>} : vector<8x32xbf16>, vector<32x128xbf16>, vector<8x128xf32> -> vector<8x128xf32>
    %114 = arith.addf %111, %113 : vector<8x128xf32>
    %115 = arith.negf %114 : vector<8x128xf32>
    %116 = math.exp %115 : vector<8x128xf32>
    %cst_27 = arith.constant 1.000000e+00 : f32
    %117 = vector.broadcast %cst_27 : f32 to vector<8x128xf32>
    %118 = arith.addf %117, %116 : vector<8x128xf32>
    %119 = arith.divf %117, %118 : vector<8x128xf32>
    %120 = math.tanh %114 : vector<8x128xf32>
    %121 = vector.extract_strided_slice %119 {offsets = [0, 0], sizes = [8, 32], strides = [1, 1]} : vector<8x128xf32> to vector<8x32xf32>
    %122 = vector.extract_strided_slice %119 {offsets = [0, 32], sizes = [8, 32], strides = [1, 1]} : vector<8x128xf32> to vector<8x32xf32>
    %123 = vector.extract_strided_slice %120 {offsets = [0, 64], sizes = [8, 32], strides = [1, 1]} : vector<8x128xf32> to vector<8x32xf32>
    %124 = vector.extract_strided_slice %119 {offsets = [0, 96], sizes = [8, 32], strides = [1, 1]} : vector<8x128xf32> to vector<8x32xf32>
    %125 = arith.mulf %122, %108 : vector<8x32xf32>
    %126 = arith.mulf %121, %123 : vector<8x32xf32>
    %127 = arith.addf %125, %126 : vector<8x32xf32>
    %128 = math.tanh %127 : vector<8x32xf32>
    %129 = arith.mulf %124, %128 : vector<8x32xf32>
    %130 = vector.extract_strided_slice %11 {offsets = [48, 0], sizes = [8, 128], strides = [1, 1]} : vector<64x128xf32> to vector<8x128xf32>
    %131 = arith.truncf %129 : vector<8x32xf32> to vector<8x32xbf16>
    %cst_28 = arith.constant dense<0.000000e+00> : vector<8x128xf32>
    %132 = tpu.matmul %131, %6, %cst_28 {dimension_numbers = #tpu.dot_dimension_numbers<[1], [0], [0], [1], [0, 0, 1, 1], [], []>} : vector<8x32xbf16>, vector<32x128xbf16>, vector<8x128xf32> -> vector<8x128xf32>
    %133 = arith.addf %130, %132 : vector<8x128xf32>
    %134 = arith.negf %133 : vector<8x128xf32>
    %135 = math.exp %134 : vector<8x128xf32>
    %cst_29 = arith.constant 1.000000e+00 : f32
    %136 = vector.broadcast %cst_29 : f32 to vector<8x128xf32>
    %137 = arith.addf %136, %135 : vector<8x128xf32>
    %138 = arith.divf %136, %137 : vector<8x128xf32>
    %139 = math.tanh %133 : vector<8x128xf32>
    %140 = vector.extract_strided_slice %138 {offsets = [0, 0], sizes = [8, 32], strides = [1, 1]} : vector<8x128xf32> to vector<8x32xf32>
    %141 = vector.extract_strided_slice %138 {offsets = [0, 32], sizes = [8, 32], strides = [1, 1]} : vector<8x128xf32> to vector<8x32xf32>
    %142 = vector.extract_strided_slice %139 {offsets = [0, 64], sizes = [8, 32], strides = [1, 1]} : vector<8x128xf32> to vector<8x32xf32>
    %143 = vector.extract_strided_slice %138 {offsets = [0, 96], sizes = [8, 32], strides = [1, 1]} : vector<8x128xf32> to vector<8x32xf32>
    %144 = arith.mulf %141, %127 : vector<8x32xf32>
    %145 = arith.mulf %140, %142 : vector<8x32xf32>
    %146 = arith.addf %144, %145 : vector<8x32xf32>
    %147 = math.tanh %146 : vector<8x32xf32>
    %148 = arith.mulf %143, %147 : vector<8x32xf32>
    %149 = vector.extract_strided_slice %11 {offsets = [56, 0], sizes = [8, 128], strides = [1, 1]} : vector<64x128xf32> to vector<8x128xf32>
    %150 = arith.truncf %148 : vector<8x32xf32> to vector<8x32xbf16>
    %cst_30 = arith.constant dense<0.000000e+00> : vector<8x128xf32>
    %151 = tpu.matmul %150, %6, %cst_30 {dimension_numbers = #tpu.dot_dimension_numbers<[1], [0], [0], [1], [0, 0, 1, 1], [], []>} : vector<8x32xbf16>, vector<32x128xbf16>, vector<8x128xf32> -> vector<8x128xf32>
    %152 = arith.addf %149, %151 : vector<8x128xf32>
    %153 = arith.negf %152 : vector<8x128xf32>
    %154 = math.exp %153 : vector<8x128xf32>
    %cst_31 = arith.constant 1.000000e+00 : f32
    %155 = vector.broadcast %cst_31 : f32 to vector<8x128xf32>
    %156 = arith.addf %155, %154 : vector<8x128xf32>
    %157 = arith.divf %155, %156 : vector<8x128xf32>
    %158 = math.tanh %152 : vector<8x128xf32>
    %159 = vector.extract_strided_slice %157 {offsets = [0, 0], sizes = [8, 32], strides = [1, 1]} : vector<8x128xf32> to vector<8x32xf32>
    %160 = vector.extract_strided_slice %157 {offsets = [0, 32], sizes = [8, 32], strides = [1, 1]} : vector<8x128xf32> to vector<8x32xf32>
    %161 = vector.extract_strided_slice %158 {offsets = [0, 64], sizes = [8, 32], strides = [1, 1]} : vector<8x128xf32> to vector<8x32xf32>
    %162 = vector.extract_strided_slice %157 {offsets = [0, 96], sizes = [8, 32], strides = [1, 1]} : vector<8x128xf32> to vector<8x32xf32>
    %163 = arith.mulf %160, %146 : vector<8x32xf32>
    %164 = arith.mulf %159, %161 : vector<8x32xf32>
    %165 = arith.addf %163, %164 : vector<8x32xf32>
    %166 = math.tanh %165 : vector<8x32xf32>
    %167 = arith.mulf %162, %166 : vector<8x32xf32>
    %c0_32 = arith.constant 0 : index
    %c0_33 = arith.constant 0 : index
    %c0_34 = arith.constant 0 : index
    %168 = vector.load %arg9[%c0_32, %c0_33, %c0_34] : memref<2x8x32xf32, #tpu.memory_space<vmem>>, vector<1x8x32xf32>
    %169 = vector.shape_cast %168 : vector<1x8x32xf32> to vector<8x32xf32>
    %170 = vector.shape_cast %167 : vector<8x32xf32> to vector<1x8x32xf32>
    tpu.vector_store %arg9[%c0_32, %c0_33, %c0_34], %170 {strides = array<i32>} : memref<2x8x32xf32, #tpu.memory_space<vmem>>, vector<1x8x32xf32>,
    %c0_35 = arith.constant 0 : index
    %c0_36 = arith.constant 0 : index
    %c0_37 = arith.constant 0 : index
    %171 = vector.load %arg10[%c0_35, %c0_36, %c0_37] : memref<2x8x32xf32, #tpu.memory_space<vmem>>, vector<1x8x32xf32>
    %172 = vector.shape_cast %171 : vector<1x8x32xf32> to vector<8x32xf32>
    %173 = vector.shape_cast %165 : vector<8x32xf32> to vector<1x8x32xf32>
    tpu.vector_store %arg10[%c0_35, %c0_36, %c0_37], %173 {strides = array<i32>} : memref<2x8x32xf32, #tpu.memory_space<vmem>>, vector<1x8x32xf32>,
    %174 = tpu.concatenate %34, %53, %72, %91, %110, %129, %148, %167 in 0 : vector<8x32xf32>, vector<8x32xf32>, vector<8x32xf32>, vector<8x32xf32>, vector<8x32xf32>, vector<8x32xf32>, vector<8x32xf32>, vector<8x32xf32> -> vector<64x32xf32>
    %175 = arith.truncf %174 : vector<64x32xf32> to vector<64x32xbf16>
    %c1 = arith.constant 1 : index
    %c0_38 = arith.constant 0 : index
    %c0_39 = arith.constant 0 : index
    %176 = vector.load %arg1[%c1, %c0_38, %c0_39] : memref<2x32x128xbf16, #tpu.memory_space<vmem>>, vector<1x32x128xbf16>
    %177 = vector.shape_cast %176 : vector<1x32x128xbf16> to vector<32x128xbf16>
    %c1_40 = arith.constant 1 : index
    %c0_41 = arith.constant 0 : index
    %c0_42 = arith.constant 0 : index
    %178 = vector.load %arg2[%c1_40, %c0_41, %c0_42] : memref<2x32x128xbf16, #tpu.memory_space<vmem>>, vector<1x32x128xbf16>
    %179 = vector.shape_cast %178 : vector<1x32x128xbf16> to vector<32x128xbf16>
    %c1_43 = arith.constant 1 : index
    %c0_44 = arith.constant 0 : index
    %c0_45 = arith.constant 0 : index
    %180 = vector.load %arg3[%c1_43, %c0_44, %c0_45] : memref<2x1x128xf32, #tpu.memory_space<vmem>>, vector<1x1x128xf32>
    %181 = vector.shape_cast %180 : vector<1x1x128xf32> to vector<1x128xf32>
    %cst_46 = arith.constant dense<0.000000e+00> : vector<64x128xf32>
    %182 = tpu.matmul %175, %177, %cst_46 {dimension_numbers = #tpu.dot_dimension_numbers<[1], [0], [0], [1], [0, 0, 1, 1], [], []>} : vector<64x32xbf16>, vector<32x128xbf16>, vector<64x128xf32> -> vector<64x128xf32>
    %183 = vector.broadcast %181 : vector<1x128xf32> to vector<64x128xf32>
    %184 = arith.addf %182, %183 : vector<64x128xf32>
    %185 = vector.extract_strided_slice %0 {offsets = [1, 0, 0], sizes = [1, 8, 32], strides = [1, 1, 1]} : vector<2x8x32xf32> to vector<1x8x32xf32>
    %186 = vector.shape_cast %185 : vector<1x8x32xf32> to vector<8x32xf32>
    %187 = vector.extract_strided_slice %1 {offsets = [1, 0, 0], sizes = [1, 8, 32], strides = [1, 1, 1]} : vector<2x8x32xf32> to vector<1x8x32xf32>
    %188 = vector.shape_cast %187 : vector<1x8x32xf32> to vector<8x32xf32>
    %189 = vector.extract_strided_slice %184 {offsets = [0, 0], sizes = [8, 128], strides = [1, 1]} : vector<64x128xf32> to vector<8x128xf32>
    %190 = arith.truncf %186 : vector<8x32xf32> to vector<8x32xbf16>
    %cst_47 = arith.constant dense<0.000000e+00> : vector<8x128xf32>
    %191 = tpu.matmul %190, %179, %cst_47 {dimension_numbers = #tpu.dot_dimension_numbers<[1], [0], [0], [1], [0, 0, 1, 1], [], []>} : vector<8x32xbf16>, vector<32x128xbf16>, vector<8x128xf32> -> vector<8x128xf32>
    %192 = arith.addf %189, %191 : vector<8x128xf32>
    %193 = arith.negf %192 : vector<8x128xf32>
    %194 = math.exp %193 : vector<8x128xf32>
    %cst_48 = arith.constant 1.000000e+00 : f32
    %195 = vector.broadcast %cst_48 : f32 to vector<8x128xf32>
    %196 = arith.addf %195, %194 : vector<8x128xf32>
    %197 = arith.divf %195, %196 : vector<8x128xf32>
    %198 = math.tanh %192 : vector<8x128xf32>
    %199 = vector.extract_strided_slice %197 {offsets = [0, 0], sizes = [8, 32], strides = [1, 1]} : vector<8x128xf32> to vector<8x32xf32>
    %200 = vector.extract_strided_slice %197 {offsets = [0, 32], sizes = [8, 32], strides = [1, 1]} : vector<8x128xf32> to vector<8x32xf32>
    %201 = vector.extract_strided_slice %198 {offsets = [0, 64], sizes = [8, 32], strides = [1, 1]} : vector<8x128xf32> to vector<8x32xf32>
    %202 = vector.extract_strided_slice %197 {offsets = [0, 96], sizes = [8, 32], strides = [1, 1]} : vector<8x128xf32> to vector<8x32xf32>
    %203 = arith.mulf %200, %188 : vector<8x32xf32>
    %204 = arith.mulf %199, %201 : vector<8x32xf32>
    %205 = arith.addf %203, %204 : vector<8x32xf32>
    %206 = math.tanh %205 : vector<8x32xf32>
    %207 = arith.mulf %202, %206 : vector<8x32xf32>
    %208 = vector.extract_strided_slice %184 {offsets = [8, 0], sizes = [8, 128], strides = [1, 1]} : vector<64x128xf32> to vector<8x128xf32>
    %209 = arith.truncf %207 : vector<8x32xf32> to vector<8x32xbf16>
    %cst_49 = arith.constant dense<0.000000e+00> : vector<8x128xf32>
    %210 = tpu.matmul %209, %179, %cst_49 {dimension_numbers = #tpu.dot_dimension_numbers<[1], [0], [0], [1], [0, 0, 1, 1], [], []>} : vector<8x32xbf16>, vector<32x128xbf16>, vector<8x128xf32> -> vector<8x128xf32>
    %211 = arith.addf %208, %210 : vector<8x128xf32>
    %212 = arith.negf %211 : vector<8x128xf32>
    %213 = math.exp %212 : vector<8x128xf32>
    %cst_50 = arith.constant 1.000000e+00 : f32
    %214 = vector.broadcast %cst_50 : f32 to vector<8x128xf32>
    %215 = arith.addf %214, %213 : vector<8x128xf32>
    %216 = arith.divf %214, %215 : vector<8x128xf32>
    %217 = math.tanh %211 : vector<8x128xf32>
    %218 = vector.extract_strided_slice %216 {offsets = [0, 0], sizes = [8, 32], strides = [1, 1]} : vector<8x128xf32> to vector<8x32xf32>
    %219 = vector.extract_strided_slice %216 {offsets = [0, 32], sizes = [8, 32], strides = [1, 1]} : vector<8x128xf32> to vector<8x32xf32>
    %220 = vector.extract_strided_slice %217 {offsets = [0, 64], sizes = [8, 32], strides = [1, 1]} : vector<8x128xf32> to vector<8x32xf32>
    %221 = vector.extract_strided_slice %216 {offsets = [0, 96], sizes = [8, 32], strides = [1, 1]} : vector<8x128xf32> to vector<8x32xf32>
    %222 = arith.mulf %219, %205 : vector<8x32xf32>
    %223 = arith.mulf %218, %220 : vector<8x32xf32>
    %224 = arith.addf %222, %223 : vector<8x32xf32>
    %225 = math.tanh %224 : vector<8x32xf32>
    %226 = arith.mulf %221, %225 : vector<8x32xf32>
    %227 = vector.extract_strided_slice %184 {offsets = [16, 0], sizes = [8, 128], strides = [1, 1]} : vector<64x128xf32> to vector<8x128xf32>
    %228 = arith.truncf %226 : vector<8x32xf32> to vector<8x32xbf16>
    %cst_51 = arith.constant dense<0.000000e+00> : vector<8x128xf32>
    %229 = tpu.matmul %228, %179, %cst_51 {dimension_numbers = #tpu.dot_dimension_numbers<[1], [0], [0], [1], [0, 0, 1, 1], [], []>} : vector<8x32xbf16>, vector<32x128xbf16>, vector<8x128xf32> -> vector<8x128xf32>
    %230 = arith.addf %227, %229 : vector<8x128xf32>
    %231 = arith.negf %230 : vector<8x128xf32>
    %232 = math.exp %231 : vector<8x128xf32>
    %cst_52 = arith.constant 1.000000e+00 : f32
    %233 = vector.broadcast %cst_52 : f32 to vector<8x128xf32>
    %234 = arith.addf %233, %232 : vector<8x128xf32>
    %235 = arith.divf %233, %234 : vector<8x128xf32>
    %236 = math.tanh %230 : vector<8x128xf32>
    %237 = vector.extract_strided_slice %235 {offsets = [0, 0], sizes = [8, 32], strides = [1, 1]} : vector<8x128xf32> to vector<8x32xf32>
    %238 = vector.extract_strided_slice %235 {offsets = [0, 32], sizes = [8, 32], strides = [1, 1]} : vector<8x128xf32> to vector<8x32xf32>
    %239 = vector.extract_strided_slice %236 {offsets = [0, 64], sizes = [8, 32], strides = [1, 1]} : vector<8x128xf32> to vector<8x32xf32>
    %240 = vector.extract_strided_slice %235 {offsets = [0, 96], sizes = [8, 32], strides = [1, 1]} : vector<8x128xf32> to vector<8x32xf32>
    %241 = arith.mulf %238, %224 : vector<8x32xf32>
    %242 = arith.mulf %237, %239 : vector<8x32xf32>
    %243 = arith.addf %241, %242 : vector<8x32xf32>
    %244 = math.tanh %243 : vector<8x32xf32>
    %245 = arith.mulf %240, %244 : vector<8x32xf32>
    %246 = vector.extract_strided_slice %184 {offsets = [24, 0], sizes = [8, 128], strides = [1, 1]} : vector<64x128xf32> to vector<8x128xf32>
    %247 = arith.truncf %245 : vector<8x32xf32> to vector<8x32xbf16>
    %cst_53 = arith.constant dense<0.000000e+00> : vector<8x128xf32>
    %248 = tpu.matmul %247, %179, %cst_53 {dimension_numbers = #tpu.dot_dimension_numbers<[1], [0], [0], [1], [0, 0, 1, 1], [], []>} : vector<8x32xbf16>, vector<32x128xbf16>, vector<8x128xf32> -> vector<8x128xf32>
    %249 = arith.addf %246, %248 : vector<8x128xf32>
    %250 = arith.negf %249 : vector<8x128xf32>
    %251 = math.exp %250 : vector<8x128xf32>
    %cst_54 = arith.constant 1.000000e+00 : f32
    %252 = vector.broadcast %cst_54 : f32 to vector<8x128xf32>
    %253 = arith.addf %252, %251 : vector<8x128xf32>
    %254 = arith.divf %252, %253 : vector<8x128xf32>
    %255 = math.tanh %249 : vector<8x128xf32>
    %256 = vector.extract_strided_slice %254 {offsets = [0, 0], sizes = [8, 32], strides = [1, 1]} : vector<8x128xf32> to vector<8x32xf32>
    %257 = vector.extract_strided_slice %254 {offsets = [0, 32], sizes = [8, 32], strides = [1, 1]} : vector<8x128xf32> to vector<8x32xf32>
    %258 = vector.extract_strided_slice %255 {offsets = [0, 64], sizes = [8, 32], strides = [1, 1]} : vector<8x128xf32> to vector<8x32xf32>
    %259 = vector.extract_strided_slice %254 {offsets = [0, 96], sizes = [8, 32], strides = [1, 1]} : vector<8x128xf32> to vector<8x32xf32>
    %260 = arith.mulf %257, %243 : vector<8x32xf32>
    %261 = arith.mulf %256, %258 : vector<8x32xf32>
    %262 = arith.addf %260, %261 : vector<8x32xf32>
    %263 = math.tanh %262 : vector<8x32xf32>
    %264 = arith.mulf %259, %263 : vector<8x32xf32>
    %265 = vector.extract_strided_slice %184 {offsets = [32, 0], sizes = [8, 128], strides = [1, 1]} : vector<64x128xf32> to vector<8x128xf32>
    %266 = arith.truncf %264 : vector<8x32xf32> to vector<8x32xbf16>
    %cst_55 = arith.constant dense<0.000000e+00> : vector<8x128xf32>
    %267 = tpu.matmul %266, %179, %cst_55 {dimension_numbers = #tpu.dot_dimension_numbers<[1], [0], [0], [1], [0, 0, 1, 1], [], []>} : vector<8x32xbf16>, vector<32x128xbf16>, vector<8x128xf32> -> vector<8x128xf32>
    %268 = arith.addf %265, %267 : vector<8x128xf32>
    %269 = arith.negf %268 : vector<8x128xf32>
    %270 = math.exp %269 : vector<8x128xf32>
    %cst_56 = arith.constant 1.000000e+00 : f32
    %271 = vector.broadcast %cst_56 : f32 to vector<8x128xf32>
    %272 = arith.addf %271, %270 : vector<8x128xf32>
    %273 = arith.divf %271, %272 : vector<8x128xf32>
    %274 = math.tanh %268 : vector<8x128xf32>
    %275 = vector.extract_strided_slice %273 {offsets = [0, 0], sizes = [8, 32], strides = [1, 1]} : vector<8x128xf32> to vector<8x32xf32>
    %276 = vector.extract_strided_slice %273 {offsets = [0, 32], sizes = [8, 32], strides = [1, 1]} : vector<8x128xf32> to vector<8x32xf32>
    %277 = vector.extract_strided_slice %274 {offsets = [0, 64], sizes = [8, 32], strides = [1, 1]} : vector<8x128xf32> to vector<8x32xf32>
    %278 = vector.extract_strided_slice %273 {offsets = [0, 96], sizes = [8, 32], strides = [1, 1]} : vector<8x128xf32> to vector<8x32xf32>
    %279 = arith.mulf %276, %262 : vector<8x32xf32>
    %280 = arith.mulf %275, %277 : vector<8x32xf32>
    %281 = arith.addf %279, %280 : vector<8x32xf32>
    %282 = math.tanh %281 : vector<8x32xf32>
    %283 = arith.mulf %278, %282 : vector<8x32xf32>
    %284 = vector.extract_strided_slice %184 {offsets = [40, 0], sizes = [8, 128], strides = [1, 1]} : vector<64x128xf32> to vector<8x128xf32>
    %285 = arith.truncf %283 : vector<8x32xf32> to vector<8x32xbf16>
    %cst_57 = arith.constant dense<0.000000e+00> : vector<8x128xf32>
    %286 = tpu.matmul %285, %179, %cst_57 {dimension_numbers = #tpu.dot_dimension_numbers<[1], [0], [0], [1], [0, 0, 1, 1], [], []>} : vector<8x32xbf16>, vector<32x128xbf16>, vector<8x128xf32> -> vector<8x128xf32>
    %287 = arith.addf %284, %286 : vector<8x128xf32>
    %288 = arith.negf %287 : vector<8x128xf32>
    %289 = math.exp %288 : vector<8x128xf32>
    %cst_58 = arith.constant 1.000000e+00 : f32
    %290 = vector.broadcast %cst_58 : f32 to vector<8x128xf32>
    %291 = arith.addf %290, %289 : vector<8x128xf32>
    %292 = arith.divf %290, %291 : vector<8x128xf32>
    %293 = math.tanh %287 : vector<8x128xf32>
    %294 = vector.extract_strided_slice %292 {offsets = [0, 0], sizes = [8, 32], strides = [1, 1]} : vector<8x128xf32> to vector<8x32xf32>
    %295 = vector.extract_strided_slice %292 {offsets = [0, 32], sizes = [8, 32], strides = [1, 1]} : vector<8x128xf32> to vector<8x32xf32>
    %296 = vector.extract_strided_slice %293 {offsets = [0, 64], sizes = [8, 32], strides = [1, 1]} : vector<8x128xf32> to vector<8x32xf32>
    %297 = vector.extract_strided_slice %292 {offsets = [0, 96], sizes = [8, 32], strides = [1, 1]} : vector<8x128xf32> to vector<8x32xf32>
    %298 = arith.mulf %295, %281 : vector<8x32xf32>
    %299 = arith.mulf %294, %296 : vector<8x32xf32>
    %300 = arith.addf %298, %299 : vector<8x32xf32>
    %301 = math.tanh %300 : vector<8x32xf32>
    %302 = arith.mulf %297, %301 : vector<8x32xf32>
    %303 = vector.extract_strided_slice %184 {offsets = [48, 0], sizes = [8, 128], strides = [1, 1]} : vector<64x128xf32> to vector<8x128xf32>
    %304 = arith.truncf %302 : vector<8x32xf32> to vector<8x32xbf16>
    %cst_59 = arith.constant dense<0.000000e+00> : vector<8x128xf32>
    %305 = tpu.matmul %304, %179, %cst_59 {dimension_numbers = #tpu.dot_dimension_numbers<[1], [0], [0], [1], [0, 0, 1, 1], [], []>} : vector<8x32xbf16>, vector<32x128xbf16>, vector<8x128xf32> -> vector<8x128xf32>
    %306 = arith.addf %303, %305 : vector<8x128xf32>
    %307 = arith.negf %306 : vector<8x128xf32>
    %308 = math.exp %307 : vector<8x128xf32>
    %cst_60 = arith.constant 1.000000e+00 : f32
    %309 = vector.broadcast %cst_60 : f32 to vector<8x128xf32>
    %310 = arith.addf %309, %308 : vector<8x128xf32>
    %311 = arith.divf %309, %310 : vector<8x128xf32>
    %312 = math.tanh %306 : vector<8x128xf32>
    %313 = vector.extract_strided_slice %311 {offsets = [0, 0], sizes = [8, 32], strides = [1, 1]} : vector<8x128xf32> to vector<8x32xf32>
    %314 = vector.extract_strided_slice %311 {offsets = [0, 32], sizes = [8, 32], strides = [1, 1]} : vector<8x128xf32> to vector<8x32xf32>
    %315 = vector.extract_strided_slice %312 {offsets = [0, 64], sizes = [8, 32], strides = [1, 1]} : vector<8x128xf32> to vector<8x32xf32>
    %316 = vector.extract_strided_slice %311 {offsets = [0, 96], sizes = [8, 32], strides = [1, 1]} : vector<8x128xf32> to vector<8x32xf32>
    %317 = arith.mulf %314, %300 : vector<8x32xf32>
    %318 = arith.mulf %313, %315 : vector<8x32xf32>
    %319 = arith.addf %317, %318 : vector<8x32xf32>
    %320 = math.tanh %319 : vector<8x32xf32>
    %321 = arith.mulf %316, %320 : vector<8x32xf32>
    %322 = vector.extract_strided_slice %184 {offsets = [56, 0], sizes = [8, 128], strides = [1, 1]} : vector<64x128xf32> to vector<8x128xf32>
    %323 = arith.truncf %321 : vector<8x32xf32> to vector<8x32xbf16>
    %cst_61 = arith.constant dense<0.000000e+00> : vector<8x128xf32>
    %324 = tpu.matmul %323, %179, %cst_61 {dimension_numbers = #tpu.dot_dimension_numbers<[1], [0], [0], [1], [0, 0, 1, 1], [], []>} : vector<8x32xbf16>, vector<32x128xbf16>, vector<8x128xf32> -> vector<8x128xf32>
    %325 = arith.addf %322, %324 : vector<8x128xf32>
    %326 = arith.negf %325 : vector<8x128xf32>
    %327 = math.exp %326 : vector<8x128xf32>
    %cst_62 = arith.constant 1.000000e+00 : f32
    %328 = vector.broadcast %cst_62 : f32 to vector<8x128xf32>
    %329 = arith.addf %328, %327 : vector<8x128xf32>
    %330 = arith.divf %328, %329 : vector<8x128xf32>
    %331 = math.tanh %325 : vector<8x128xf32>
    %332 = vector.extract_strided_slice %330 {offsets = [0, 0], sizes = [8, 32], strides = [1, 1]} : vector<8x128xf32> to vector<8x32xf32>
    %333 = vector.extract_strided_slice %330 {offsets = [0, 32], sizes = [8, 32], strides = [1, 1]} : vector<8x128xf32> to vector<8x32xf32>
    %334 = vector.extract_strided_slice %331 {offsets = [0, 64], sizes = [8, 32], strides = [1, 1]} : vector<8x128xf32> to vector<8x32xf32>
    %335 = vector.extract_strided_slice %330 {offsets = [0, 96], sizes = [8, 32], strides = [1, 1]} : vector<8x128xf32> to vector<8x32xf32>
    %336 = arith.mulf %333, %319 : vector<8x32xf32>
    %337 = arith.mulf %332, %334 : vector<8x32xf32>
    %338 = arith.addf %336, %337 : vector<8x32xf32>
    %339 = math.tanh %338 : vector<8x32xf32>
    %340 = arith.mulf %335, %339 : vector<8x32xf32>
    %c1_63 = arith.constant 1 : index
    %c0_64 = arith.constant 0 : index
    %c0_65 = arith.constant 0 : index
    %341 = vector.load %arg9[%c1_63, %c0_64, %c0_65] : memref<2x8x32xf32, #tpu.memory_space<vmem>>, vector<1x8x32xf32>
    %342 = vector.shape_cast %341 : vector<1x8x32xf32> to vector<8x32xf32>
    %343 = vector.shape_cast %340 : vector<8x32xf32> to vector<1x8x32xf32>
    tpu.vector_store %arg9[%c1_63, %c0_64, %c0_65], %343 {strides = array<i32>} : memref<2x8x32xf32, #tpu.memory_space<vmem>>, vector<1x8x32xf32>,
    %c1_66 = arith.constant 1 : index
    %c0_67 = arith.constant 0 : index
    %c0_68 = arith.constant 0 : index
    %344 = vector.load %arg10[%c1_66, %c0_67, %c0_68] : memref<2x8x32xf32, #tpu.memory_space<vmem>>, vector<1x8x32xf32>
    %345 = vector.shape_cast %344 : vector<1x8x32xf32> to vector<8x32xf32>
    %346 = vector.shape_cast %338 : vector<8x32xf32> to vector<1x8x32xf32>
    tpu.vector_store %arg10[%c1_66, %c0_67, %c0_68], %346 {strides = array<i32>} : memref<2x8x32xf32, #tpu.memory_space<vmem>>, vector<1x8x32xf32>,
    %347 = tpu.concatenate %207, %226, %245, %264, %283, %302, %321, %340 in 0 : vector<8x32xf32>, vector<8x32xf32>, vector<8x32xf32>, vector<8x32xf32>, vector<8x32xf32>, vector<8x32xf32>, vector<8x32xf32>, vector<8x32xf32> -> vector<64x32xf32>
    %348 = arith.truncf %347 : vector<64x32xf32> to vector<64x32xbf16>
    %c0_69 = arith.constant 0 : index
    %c0_70 = arith.constant 0 : index
    %349 = vector.load %arg6[%c0_69, %c0_70] : memref<32x128xbf16, #tpu.memory_space<vmem>>, vector<32x128xbf16>
    %cst_71 = arith.constant dense<0.000000e+00> : vector<64x128xf32>
    %350 = tpu.matmul %348, %349, %cst_71 {dimension_numbers = #tpu.dot_dimension_numbers<[1], [0], [0], [1], [0, 0, 1, 1], [], []>} : vector<64x32xbf16>, vector<32x128xbf16>, vector<64x128xf32> -> vector<64x128xf32>
    %c0_72 = arith.constant 0 : index
    %c0_73 = arith.constant 0 : index
    %351 = vector.load %arg7[%c0_72, %c0_73] : memref<1x128xf32, #tpu.memory_space<vmem>>, vector<1x128xf32>
    %352 = vector.broadcast %351 : vector<1x128xf32> to vector<64x128xf32>
    %353 = arith.addf %350, %352 : vector<64x128xf32>
    %354 = math.exp %353 : vector<64x128xf32>
    %cst_74 = arith.constant 0.000000e+00 : f32
    %355 = vector.broadcast %cst_74 : f32 to vector<64x128xf32>
    %356 = arith.subf %355, %354 : vector<64x128xf32>
    %c0_75 = arith.constant 0 : index
    %c0_76 = arith.constant 0 : index
    %357 = vector.load %arg8[%c0_75, %c0_76] : memref<64x128xf32, #tpu.memory_space<vmem>>, vector<64x128xf32>
    tpu.vector_store %arg8[%c0_75, %c0_76], %356 {strides = array<i32>} : memref<64x128xf32, #tpu.memory_space<vmem>>, vector<64x128xf32>,
    return
  }
}

</mosaic_0001>

<bundles_post_ra>
// kernel: syntax_lstm_forward.1
= control target key start
LH: loop header
LB: loop body
LE: loop exit
PB: predicated region body
PF: predicated region fallthrough
CT: control target
= control target key end

     0   :  { %vm92_vm0 = vcmask 261120   ;;  %v2122_v7 = vmov 0.0   ;;  %vm2123_vm1 = vmmov 0   ;;  %s2124_s12 = smov 64   ;;  %s2125_s15 = smov 32   ;;  %s2609_s1 = inlined_call_operand.vmem [shape: bf16[2,32,128], index: 1, kind: input, shape index: {}]   ;;  %s2610_s0 = inlined_call_operand.vmem [shape: bf16[64,32], index: 0, kind: input, shape index: {}]   ;;  %s2611_s2 = inlined_call_operand.vmem [shape: bf16[2,32,128], index: 2, kind: input, shape index: {}]   ;;  %s2612_s4 = inlined_call_operand.vmem [shape: f32[2,8,32], index: 4, kind: input, shape index: {}, may-alias: {4,9}]   ;;  %s2613_s3 = inlined_call_operand.vmem [shape: f32[2,1,128], index: 3, kind: input, shape index: {}]   ;;  %s2614_s5 = inlined_call_operand.vmem [shape: f32[2,8,32], index: 5, kind: input, shape index: {}, may-alias: {5,10}]   ;;  %s2615_s6 = inlined_call_operand.vmem [shape: bf16[32,128], index: 6, kind: input, shape index: {}]   ;;  %s2616_s9 = inlined_call_operand.vmem [shape: f32[2,8,32], index: 9, kind: output, shape index: {1}, may-alias: {4,9}]   ;;  %s2617_s10 = inlined_call_operand.vmem [shape: f32[2,8,32], index: 10, kind: output, shape index: {2}, may-alias: {5,10}]   ;;  %s2618_s7 = inlined_call_operand.vmem [shape: f32[1,128], index: 7, kind: input, shape index: {}]   ;;  %s2619_s8 = inlined_call_operand.vmem [shape: f32[64,128], index: 8, kind: output, shape index: {0}]  }
   0x1   :  { %v1964_v0 = vld [vmem:[%s2609_s1] sm:$0xff]   ;;  %v1965_v1 = vld [vmem:[%s2609_s1 + $0x8] sm:$0xff]   ;;  %v1966_v2 = vld [vmem:[%s2610_s0 + $0x10] sm:$0xff]  }
   0x2   :  { %1955 = vmatprep.subr.bf16.mxu1 %v1964_v0  ;;  %1791 = vmatprep.subr.bf16.mxu0 %v1964_v0  ;;  %v1967_v3 = vld [vmem:[%s2610_s0 + $0x18] sm:$0xff]   ;;  %v1969_v4 = vld [vmem:[%s2610_s0] sm:$0xff]   ;;  %v1970_v5 = vld [vmem:[%s2610_s0 + $0x8] sm:$0xff]  }
   0x3   :  { %1957 = vmatpush3.bf16.msra.mxu1 %v1964_v0  ;;  %1792 = vmatpush3.bf16.msra.mxu0 %v1964_v0  ;;  %v2204_v6 = vld [vmem:[%s2611_s2] sm:$0xff]   ;;  %v2215_v8 = vld [vmem:[%s2611_s2 + $0x8] sm:$0xff]  }
   0x4   :  { %1956 = vmatprep.subr.bf16.mxu1 %v1965_v1  ;;  %1793 = vmatprep.subr.bf16.mxu0 %v1965_v1  ;;  %v33_v9 = vld [vmem:[%s2612_s4] sm:$0xff] }
   0x5   :  { %1799 = vmatprep.mubr.msk.bf16.mxu1 %vm92_vm0, %v1966_v2  ;;  %1795 = vmatprep.mubr.msk.bf16.mxu0 %vm92_vm0, %v1969_v4  ;;  %v170_v10 = vpack.c.bf16 %v33_v9, %v33_v9  ;;  %v1653_v11 = vld [vmem:[%s2613_s3] ss:$0 sm:$0xff] }
   0x6   :  { %v35_v34 = vld [vmem:[%s2614_s5] sm:$0xff] }
   0x7   :  { %1958 = vmatpush3.bf16.msra.mxu1 %v1965_v1  ;;  %1794 = vmatpush3.bf16.msra.mxu0 %v1965_v1 }
   0x8   :  { %1803 = vmatprep.subr.bf16.mxu1 %v2122_v7  ;;  %1819 = vmatprep.subr.bf16.mxu0 %v2122_v7 }
   0xa   :  { %1800 = vmatmul.mubr.msk.bf16.vlgmr.msra.gmra.mrb[0].mxu1 %vm92_vm0, %v1967_v3  ;;  %1796 = vmatmul.mubr.msk.bf16.vlgmr.msra.gmra.mrb[0].mxu0 %vm92_vm0, %v1970_v5 }
   0xb   :  { %1804 = vmatpush3.bf16.msra.mxu1 %v2204_v6  ;;  %1807 = vmatprep.mubr.msk.bf16.mxu1 %vm2123_vm1, %v2122_v7 }
   0xc   :  { %1805 = vmatprep.subr.bf16.mxu1 %v2122_v7  ;;  %1820 = vmatpush3.bf16.msra.mxu0 %v2204_v6 }
   0xd   :  { %1821 = vmatprep.subr.bf16.mxu0 %v2122_v7  ;;  %1823 = vmatprep.mubr.msk.bf16.mxu0 %vm2123_vm1, %v2122_v7 }
   0xf   :  { %1806 = vmatpush3.bf16.msra.mxu1 %v2215_v8 }
  0x10   :  { %1811 = vmatprep.subr.bf16.mxu1 %v2122_v7  ;;  %1822 = vmatpush3.bf16.msra.mxu0 %v2215_v8 }
  0x11   :  { %1835 = vmatprep.subr.bf16.mxu0 %v2122_v7 }
  0x12   :  { %1808 = vmatmul.mubr.msk.bf16.vlgmr.msra.gmra.mrb[4].mxu1 %vm92_vm0, %v170_v10 }
  0x13   :  { %1812 = vmatpush3.bf16.msra.mxu1 %v2204_v6  ;;  %1815 = vmatprep.mubr.msk.bf16.mxu1 %vm2123_vm1, %v2122_v7 }
  0x14   :  { %1813 = vmatprep.subr.bf16.mxu1 %v2122_v7 }
  0x17   :  { %1814 = vmatpush3.bf16.msra.mxu1 %v2215_v8 }
  0x18   :  { %1827 = vmatprep.subr.bf16.mxu1 %v2122_v7 }
  0xdd   :  { %v1801_v12 = vpop.f32.mrb[0].mxu1  ;;  %v1797_v13 = vpop.f32.mrb[0].mxu0 }
  0xde   :  { %v2241_v14 = vadd.f32 %v1801_v12, %v1653_v11  ;;  %v155_v15 = vpop.f32.mrb[1].mxu1  ;;  %v2243_v16 = vadd.f32 %v1797_v13, %v1653_v11  ;;  %v139_v17 = vpop.f32.mrb[1].mxu0 }
  0xdf   :  { %v2245_v18 = vadd.f32 %v1653_v11, %v155_v15  ;;  %v1802_v19 = vpop.f32.mrb[2].mxu1  ;;  %v1798_v20 = vpop.f32.mrb[2].mxu0  ;;  %v140_v27 = vadd.f32 %v1653_v11, %v139_v17 }
  0xe0   :  { %v2247_v21 = vadd.f32 %v1802_v19, %v1653_v11  ;;  %v158_v22 = vpop.f32.mrb[3].mxu1  ;;  %v2249_v23 = vadd.f32 %v1798_v20, %v1653_v11  ;;  %v142_v24 = vpop.f32.mrb[3].mxu0 }
  0xe1   :  { %v2251_v25 = vadd.f32 %v1653_v11, %v158_v22  ;;  %v143_v26 = vadd.f32 %v1653_v11, %v142_v24 }
  0xe5   :  { %v220_v28 = vpop.f32.mrb[4].mxu1 }
  0xe6   :  { %v226_v29 = vadd.f32 %v220_v28, %v140_v27  ;;  %v1809_v30 = vpop.f32.mrb[5].mxu1 }
  0xe7   :  { %v223_v31 = vpop.f32.mrb[6].mxu1 }
  0xe8   :  { %1978 = vtanh.f32 %v226_v29  ;;  %v1810_v32 = vpop.f32.mrb[7].mxu1  ;;  %v1667_v35 = vmul.f32 -1.442695, %v226_v29 }
  0xea   :  { %1980 = vpow2.f32 %v1667_v35 }
  0xf2   :  { %v1979_v33 = vpop.eup %1978 }
  0xf3   :  { %240 = vrot.lane.b32.xlu0 %v1979_v33, %s2124_s12 }
  0xf4   :  { %v1981_v36 = vpop.eup %1980 }
  0xf5   :  { %v230_v37 = vadd.f32 1.0, %v1981_v36 }
  0xf7   :  { %235 = vrot.lane.b32.xlu0 %v35_v34, %s2125_s15  ;;  %1982 = vrcp.f32 %v230_v37 }
 0x101   :  { %v1983_v38 = vpop.eup %1982 }
 0x165   :  { %v241_v39 = vpop.permute.xlu0 %240 }
 0x166   :  { %v243_v40 = vmul.f32 %v1983_v38, %v241_v39 }
 0x168   :  { %245 = vrot.lane.b32.xlu1 %v243_v40, %s2125_s15 }
 0x169   :  { %v236_v41 = vpop.permute.xlu0 %235 }
 0x16a   :  { %v238_v42 = vmul.f32 %v1983_v38, %v236_v41 }
 0x1da   :  { %v246_v43 = vpop.permute.xlu1 %245 }
 0x1db   :  { %v248_v44 = vadd.f32 %v246_v43, %v238_v42 }
 0x1dd   :  { %1984 = vtanh.f32 %v248_v44 }
 0x1e7   :  { %v1985_v45 = vpop.eup %1984 }
 0x1e8   :  { %251 = vrot.lane.b32.xlu1 %v1985_v45, %s2124_s12 }
 0x25a   :  { %v252_v46 = vpop.permute.xlu1 %251 }
 0x25b   :  { %v2260_v47 = vmul.f32 %v1983_v38, %v252_v46 }
 0x25d   :  { %v255_v48 = vpack.c.bf16 %v2260_v47, %v2260_v47 }
 0x25f   :  { %257 = vrot.lane.b32.xlu0 %v255_v48, %s2125_s15 }
 0x2d1   :  { %v258_v49 = vpop.permute.xlu0 %257 }
 0x2d2   :  { %1816 = vmatmul.mubr.msk.bf16.vlgmr.msra.gmra.mrb[8].mxu1 %vm92_vm0, %v258_v49 }
 0x2d3   :  { %1828 = vmatpush3.bf16.msra.mxu1 %v2204_v6  ;;  %1831 = vmatprep.mubr.msk.bf16.mxu1 %vm2123_vm1, %v2122_v7 }
 0x2d4   :  { %1829 = vmatprep.subr.bf16.mxu1 %v2122_v7 }
 0x2d7   :  { %1830 = vmatpush3.bf16.msra.mxu1 %v2215_v8 }
 0x2d8   :  { %1843 = vmatprep.subr.bf16.mxu1 %v2122_v7 }
 0x3a5   :  { %v296_v50 = vpop.f32.mrb[8].mxu1 }
 0x3a6   :  { %v302_v51 = vadd.f32 %v296_v50, %v143_v26  ;;  %v1817_v52 = vpop.f32.mrb[9].mxu1 }
 0x3a7   :  { %v299_v53 = vpop.f32.mrb[10].mxu1 }
 0x3a8   :  { %1986 = vtanh.f32 %v302_v51  ;;  %v1818_v54 = vpop.f32.mrb[11].mxu1  ;;  %v1669_v56 = vmul.f32 -1.442695, %v302_v51 }
 0x3aa   :  { %1988 = vpow2.f32 %v1669_v56 }
 0x3b2   :  { %v1987_v55 = vpop.eup %1986 }
 0x3b3   :  { %312 = vrot.lane.b32.xlu1 %v1987_v55, %s2124_s12 }
 0x3b4   :  { %v1989_v57 = vpop.eup %1988 }
 0x3b5   :  { %v306_v58 = vadd.f32 1.0, %v1989_v57 }
 0x3b7   :  { %1990 = vrcp.f32 %v306_v58 }
 0x3c1   :  { %v1991_v59 = vpop.eup %1990 }
 0x3c2   :  { %v310_v62 = vmul.f32 %v1991_v59, %v248_v44 }
 0x425   :  { %v313_v60 = vpop.permute.xlu1 %312 }
 0x426   :  { %v315_v61 = vmul.f32 %v1991_v59, %v313_v60 }
 0x428   :  { %317 = vrot.lane.b32.xlu0 %v315_v61, %s2125_s15 }
 0x49a   :  { %v318_v63 = vpop.permute.xlu0 %317 }
 0x49b   :  { %v320_v0 = vadd.f32 %v318_v63, %v310_v62 }
 0x49d   :  { %1992 = vtanh.f32 %v320_v0 }
 0x4a7   :  { %v1993_v1 = vpop.eup %1992 }
 0x4a8   :  { %323 = vrot.lane.b32.xlu1 %v1993_v1, %s2124_s12 }
 0x51a   :  { %v324_v2 = vpop.permute.xlu1 %323 }
 0x51b   :  { %v2275_v3 = vmul.f32 %v1991_v59, %v324_v2 }
 0x51d   :  { %v327_v4 = vpack.c.bf16 %v2275_v3, %v2275_v3 }
 0x51f   :  { %329 = vrot.lane.b32.xlu0 %v327_v4, %s2125_s15 }
 0x591   :  { %v330_v5 = vpop.permute.xlu0 %329 }
 0x592   :  { %1824 = vmatmul.mubr.msk.bf16.vlgmr.msra.gmra.mrb[4].mxu0 %vm92_vm0, %v330_v5 }
 0x593   :  { %1836 = vmatpush3.bf16.msra.mxu0 %v2204_v6  ;;  %1839 = vmatprep.mubr.msk.bf16.mxu0 %vm2123_vm1, %v2122_v7 }
 0x594   :  { %1837 = vmatprep.subr.bf16.mxu0 %v2122_v7 }
 0x597   :  { %1838 = vmatpush3.bf16.msra.mxu0 %v2215_v8 }
 0x598   :  { %1851 = vmatprep.subr.bf16.mxu0 %v2122_v7 }
 0x665   :  { %v368_v9 = vpop.f32.mrb[4].mxu0 }
 0x666   :  { %v374_v10 = vadd.f32 %v368_v9, %v2243_v16  ;;  %v1825_v11 = vpop.f32.mrb[5].mxu0 }
 0x667   :  { %v371_v12 = vpop.f32.mrb[6].mxu0 }
 0x668   :  { %1994 = vtanh.f32 %v374_v10  ;;  %v1826_v13 = vpop.f32.mrb[7].mxu0  ;;  %v1671_v17 = vmul.f32 -1.442695, %v374_v10 }
 0x66a   :  { %1996 = vpow2.f32 %v1671_v17 }
 0x672   :  { %v1995_v15 = vpop.eup %1994 }
 0x673   :  { %384 = vrot.lane.b32.xlu1 %v1995_v15, %s2124_s12 }
 0x674   :  { %v1997_v19 = vpop.eup %1996 }
 0x675   :  { %v378_v20 = vadd.f32 1.0, %v1997_v19 }
 0x677   :  { %1998 = vrcp.f32 %v378_v20 }
 0x681   :  { %v1999_v22 = vpop.eup %1998 }
 0x682   :  { %v382_v27 = vmul.f32 %v1999_v22, %v320_v0 }
 0x6e5   :  { %v385_v24 = vpop.permute.xlu1 %384 }
 0x6e6   :  { %v387_v26 = vmul.f32 %v1999_v22, %v385_v24 }
 0x6e8   :  { %389 = vrot.lane.b32.xlu0 %v387_v26, %s2125_s15 }
 0x75a   :  { %v390_v28 = vpop.permute.xlu0 %389 }
 0x75b   :  { %v392_v16 = vadd.f32 %v390_v28, %v382_v27 }
 0x75d   :  { %2000 = vtanh.f32 %v392_v16 }
 0x767   :  { %v2001_v29 = vpop.eup %2000 }
 0x768   :  { %395 = vrot.lane.b32.xlu1 %v2001_v29, %s2124_s12 }
 0x7da   :  { %v396_v30 = vpop.permute.xlu1 %395 }
 0x7db   :  { %v2291_v31 = vmul.f32 %v1999_v22, %v396_v30 }
 0x7dd   :  { %v399_v32 = vpack.c.bf16 %v2291_v31, %v2291_v31 }
 0x7df   :  { %401 = vrot.lane.b32.xlu0 %v399_v32, %s2125_s15 }
 0x851   :  { %v402_v33 = vpop.permute.xlu0 %401 }
 0x852   :  { %1832 = vmatmul.mubr.msk.bf16.vlgmr.msra.gmra.mrb[12].mxu1 %vm92_vm0, %v402_v33 }
 0x853   :  { %1844 = vmatpush3.bf16.msra.mxu1 %v2204_v6  ;;  %1847 = vmatprep.mubr.msk.bf16.mxu1 %vm2123_vm1, %v2122_v7 }
 0x854   :  { %1845 = vmatprep.subr.bf16.mxu1 %v2122_v7 }
 0x857   :  { %1846 = vmatpush3.bf16.msra.mxu1 %v2215_v8 }
 0x858   :  { %1859 = vmatprep.subr.bf16.mxu1 %v2122_v7 }
 0x925   :  { %v440_v34 = vpop.f32.mrb[12].mxu1 }
 0x926   :  { %v446_v35 = vadd.f32 %v440_v34, %v2249_v23  ;;  %v1833_v36 = vpop.f32.mrb[13].mxu1 }
 0x927   :  { %v443_v37 = vpop.f32.mrb[14].mxu1 }
 0x928   :  { %2002 = vtanh.f32 %v446_v35  ;;  %v1834_v38 = vpop.f32.mrb[15].mxu1  ;;  %v1673_v40 = vmul.f32 -1.442695, %v446_v35 }
 0x92a   :  { %2004 = vpow2.f32 %v1673_v40 }
 0x932   :  { %v2003_v39 = vpop.eup %2002 }
 0x933   :  { %456 = vrot.lane.b32.xlu1 %v2003_v39, %s2124_s12 }
 0x934   :  { %v2005_v41 = vpop.eup %2004 }
 0x935   :  { %v450_v42 = vadd.f32 1.0, %v2005_v41 }
 0x937   :  { %2006 = vrcp.f32 %v450_v42 }
 0x941   :  { %v2007_v43 = vpop.eup %2006 }
 0x942   :  { %v454_v46 = vmul.f32 %v2007_v43, %v392_v16 }
 0x9a5   :  { %v457_v44 = vpop.permute.xlu1 %456 }
 0x9a6   :  { %v459_v45 = vmul.f32 %v2007_v43, %v457_v44 }
 0x9a8   :  { %461 = vrot.lane.b32.xlu0 %v459_v45, %s2125_s15 }
 0xa1a   :  { %v462_v48 = vpop.permute.xlu0 %461 }
 0xa1b   :  { %v464_v23 = vadd.f32 %v462_v48, %v454_v46 }
 0xa1d   :  { %2008 = vtanh.f32 %v464_v23 }
 0xa27   :  { %v2009_v49 = vpop.eup %2008 }
 0xa28   :  { %467 = vrot.lane.b32.xlu1 %v2009_v49, %s2124_s12 }
 0xa9a   :  { %v468_v50 = vpop.permute.xlu1 %467 }
 0xa9b   :  { %v2307_v51 = vmul.f32 %v2007_v43, %v468_v50  ;;  %v1972_v50 = vld [vmem:[%s2609_s1 + $0x10] sm:$0xff]  }
 0xa9d   :  { %v471_v52 = vpack.c.bf16 %v2307_v51, %v2307_v51 }
 0xa9f   :  { %473 = vrot.lane.b32.xlu0 %v471_v52, %s2125_s15 }
 0xb11   :  { %v474_v53 = vpop.permute.xlu0 %473 }
 0xb12   :  { %1840 = vmatmul.mubr.msk.bf16.vlgmr.msra.gmra.mrb[8].mxu0 %vm92_vm0, %v474_v53  ;;  %v769_v53 = vpack.c.bf16 %v2275_v3, %v2260_v47  ;;  %v770_v47 = vpack.c.bf16 %v2307_v51, %v2291_v31  ;;  %v36_v3 = vld [vmem:[%s2614_s5 + $0x8] sm:$0xff]  ;;  %v2384_v31 = vld [vmem:[%s2611_s2 + $0x18] sm:$0xff]  }
 0xb13   :  { %1852 = vmatpush3.bf16.msra.mxu0 %v2204_v6  ;;  %1855 = vmatprep.mubr.msk.bf16.mxu0 %vm2123_vm1, %v2122_v7  ;;  %v34_v51 = vld [vmem:[%s2612_s4 + $0x8] sm:$0xff] }
 0xb14   :  { %1853 = vmatprep.subr.bf16.mxu0 %v2122_v7 }
 0xb17   :  { %1854 = vmatpush3.bf16.msra.mxu0 %v2215_v8 }
 0xb18   :  { %1867 = vmatprep.subr.bf16.mxu0 %v1972_v50 }
 0xbe5   :  { %v512_v54 = vpop.f32.mrb[8].mxu0 }
 0xbe6   :  { %v518_v55 = vadd.f32 %v512_v54, %v2245_v18  ;;  %v1841_v56 = vpop.f32.mrb[9].mxu0  ;;  %v1973_v54 = vld [vmem:[%s2609_s1 + $0x18] sm:$0xff]  }
 0xbe7   :  { %v515_v57 = vpop.f32.mrb[10].mxu0 }
 0xbe8   :  { %2010 = vtanh.f32 %v518_v55  ;;  %v1842_v58 = vpop.f32.mrb[11].mxu0  ;;  %v1675_v60 = vmul.f32 -1.442695, %v518_v55 }
 0xbea   :  { %2012 = vpow2.f32 %v1675_v60 }
 0xbf2   :  { %v2011_v59 = vpop.eup %2010 }
 0xbf3   :  { %528 = vrot.lane.b32.xlu1 %v2011_v59, %s2124_s12  ;;  %v2377_v59 = vld [vmem:[%s2611_s2 + $0x10] sm:$0xff]  }
 0xbf4   :  { %v2013_v61 = vpop.eup %2012 }
 0xbf5   :  { %v522_v62 = vadd.f32 1.0, %v2013_v61 }
 0xbf7   :  { %2014 = vrcp.f32 %v522_v62  ;;  %v892_v62 = vpack.c.bf16 %v34_v51, %v34_v51 }
 0xc01   :  { %v2015_v63 = vpop.eup %2014 }
 0xc02   :  { %v526_v2 = vmul.f32 %v2015_v63, %v464_v23 }
 0xc65   :  { %v529_v0 = vpop.permute.xlu1 %528 }
 0xc66   :  { %v531_v1 = vmul.f32 %v2015_v63, %v529_v0 }
 0xc68   :  { %533 = vrot.lane.b32.xlu0 %v531_v1, %s2125_s15 }
 0xcda   :  { %v534_v4 = vpop.permute.xlu0 %533 }
 0xcdb   :  { %v536_v18 = vadd.f32 %v534_v4, %v526_v2 }
 0xcdd   :  { %2016 = vtanh.f32 %v536_v18 }
 0xce7   :  { %v2017_v5 = vpop.eup %2016 }
 0xce8   :  { %539 = vrot.lane.b32.xlu1 %v2017_v5, %s2124_s12 }
 0xd5a   :  { %v540_v9 = vpop.permute.xlu1 %539 }
 0xd5b   :  { %v2322_v10 = vmul.f32 %v2015_v63, %v540_v9 }
 0xd5d   :  { %v543_v11 = vpack.c.bf16 %v2322_v10, %v2322_v10 }
 0xd5f   :  { %545 = vrot.lane.b32.xlu0 %v543_v11, %s2125_s15 }
 0xdd1   :  { %v546_v12 = vpop.permute.xlu0 %545 }
 0xdd2   :  { %1848 = vmatmul.mubr.msk.bf16.vlgmr.msra.gmra.mrb[16].mxu1 %vm92_vm0, %v546_v12 }
 0xdd3   :  { %1860 = vmatpush3.bf16.msra.mxu1 %v2204_v6  ;;  %1863 = vmatprep.mubr.msk.bf16.mxu1 %vm2123_vm1, %v2122_v7 }
 0xdd4   :  { %1861 = vmatprep.subr.bf16.mxu1 %v2122_v7 }
 0xdd7   :  { %1862 = vmatpush3.bf16.msra.mxu1 %v2215_v8 }
 0xdd8   :  { %1879 = vmatprep.subr.bf16.mxu1 %v2122_v7 }
 0xea5   :  { %v584_v13 = vpop.f32.mrb[16].mxu1 }
 0xea6   :  { %v590_v15 = vadd.f32 %v584_v13, %v2251_v25  ;;  %v1849_v17 = vpop.f32.mrb[17].mxu1 }
 0xea7   :  { %v587_v19 = vpop.f32.mrb[18].mxu1 }
 0xea8   :  { %2018 = vtanh.f32 %v590_v15  ;;  %v1850_v20 = vpop.f32.mrb[19].mxu1  ;;  %v1677_v6 = vmul.f32 -1.442695, %v590_v15 }
 0xeaa   :  { %2020 = vpow2.f32 %v1677_v6 }
 0xeb2   :  { %v2019_v22 = vpop.eup %2018 }
 0xeb3   :  { %600 = vrot.lane.b32.xlu1 %v2019_v22, %s2124_s12 }
 0xeb4   :  { %v2021_v24 = vpop.eup %2020 }
 0xeb5   :  { %v594_v26 = vadd.f32 1.0, %v2021_v24 }
 0xeb7   :  { %2022 = vrcp.f32 %v594_v26 }
 0xec1   :  { %v2023_v27 = vpop.eup %2022 }
 0xec2   :  { %v598_v16 = vmul.f32 %v2023_v27, %v536_v18  ;;  %v2410_v18 = vld [vmem:[%s2613_s3 + $0x1] ss:$0 sm:$0xff] }
 0xf25   :  { %v601_v28 = vpop.permute.xlu1 %600 }
 0xf26   :  { %v603_v8 = vmul.f32 %v2023_v27, %v601_v28 }
 0xf28   :  { %605 = vrot.lane.b32.xlu0 %v603_v8, %s2125_s15 }
 0xf9a   :  { %v606_v29 = vpop.permute.xlu0 %605 }
 0xf9b   :  { %v608_v25 = vadd.f32 %v606_v29, %v598_v16 }
 0xf9d   :  { %2024 = vtanh.f32 %v608_v25 }
 0xfa7   :  { %v2025_v30 = vpop.eup %2024 }
 0xfa8   :  { %611 = vrot.lane.b32.xlu1 %v2025_v30, %s2124_s12 }
0x101a   :  { %v612_v32 = vpop.permute.xlu1 %611 }
0x101b   :  { %v2338_v33 = vmul.f32 %v2023_v27, %v612_v32 }
0x101d   :  { %v615_v34 = vpack.c.bf16 %v2338_v33, %v2338_v33 }
0x101f   :  { %617 = vrot.lane.b32.xlu0 %v615_v34, %s2125_s15 }
0x1091   :  { %v618_v35 = vpop.permute.xlu0 %617 }
0x1092   :  { %1856 = vmatmul.mubr.msk.bf16.vlgmr.msra.gmra.mrb[12].mxu0 %vm92_vm0, %v618_v35 }
0x1093   :  { %1868 = vmatpush3.bf16.msra.mxu0 %v1972_v50 }
0x1094   :  { %1869 = vmatprep.subr.bf16.mxu0 %v1973_v54 }
0x1097   :  { %1870 = vmatpush3.bf16.msra.mxu0 %v1973_v54 }
0x1098   :  { %1895 = vmatprep.subr.bf16.mxu0 %v2122_v7 }
0x1165   :  { %v656_v36 = vpop.f32.mrb[12].mxu0 }
0x1166   :  { %v662_v37 = vadd.f32 %v656_v36, %v2241_v14  ;;  %v1857_v38 = vpop.f32.mrb[13].mxu0 }
0x1167   :  { %v659_v39 = vpop.f32.mrb[14].mxu0 }
0x1168   :  { %2026 = vtanh.f32 %v662_v37  ;;  %v1858_v40 = vpop.f32.mrb[15].mxu0  ;;  %v1679_v42 = vmul.f32 -1.442695, %v662_v37 }
0x116a   :  { %2028 = vpow2.f32 %v1679_v42 }
0x1172   :  { %v2027_v41 = vpop.eup %2026 }
0x1173   :  { %672 = vrot.lane.b32.xlu1 %v2027_v41, %s2124_s12 }
0x1174   :  { %v2029_v43 = vpop.eup %2028 }
0x1175   :  { %v666_v44 = vadd.f32 1.0, %v2029_v43 }
0x1177   :  { %2030 = vrcp.f32 %v666_v44 }
0x1181   :  { %v2031_v45 = vpop.eup %2030 }
0x1182   :  { %v670_v23 = vmul.f32 %v2031_v45, %v608_v25 }
0x11e5   :  { %v673_v46 = vpop.permute.xlu1 %672 }
0x11e6   :  { %v675_v48 = vmul.f32 %v2031_v45, %v673_v46 }
0x11e8   :  { %677 = vrot.lane.b32.xlu0 %v675_v48, %s2125_s15 }
0x125a   :  { %v678_v49 = vpop.permute.xlu0 %677 }
0x125b   :  { %v2347_v14 = vadd.f32 %v678_v49, %v670_v23  ;;  %v771_v49 = vpack.c.bf16 %v2338_v33, %v2322_v10 }
0x125d   :  { %2032 = vtanh.f32 %v2347_v14 }
0x1267   :  { %v2033_v52 = vpop.eup %2032 }
0x1268   :  { %683 = vrot.lane.b32.xlu1 %v2033_v52, %s2124_s12 }
0x126c   :  { %795 = vrot.lane.b32.xlu1 %v769_v53, %s2125_s15 }
0x12da   :  { %v684_v55 = vpop.permute.xlu1 %683 }
0x12db   :  { %v2361_v56 = vmul.f32 %v2031_v45, %v684_v55 }
0x12dd   :  { %v687_v57 = vpack.c.bf16 %v2361_v56, %v2361_v56 }
0x12de   :  { %v796_v58 = vpop.permute.xlu1 %795 }
0x12df   :  { %689 = vrot.lane.b32.xlu0 %v687_v57, %s2125_s15  ;;  %1871 = vmatprep.mubr.msk.bf16.mxu0 %vm92_vm0, %v796_v58 }
0x12e3   :  { %797 = vrot.lane.b32.xlu0 %v770_v47, %s2125_s15 }
0x12e7   :  { %957 = vrot.lane.b32.xlu0 %v36_v3, %s2125_s15 }
0x1351   :  { %v690_v60 = vpop.permute.xlu0 %689 }
0x1352   :  { %1864 = vmatmul.mubr.msk.bf16.vlgmr.msra.gmra.mrb[20].mxu1 %vm92_vm0, %v690_v60 }
0x1353   :  { %1880 = vmatpush3.bf16.msra.mxu1 %v2377_v59  ;;  %1883 = vmatprep.mubr.msk.bf16.mxu1 %vm2123_vm1, %v2122_v7 }
0x1354   :  { %1881 = vmatprep.subr.bf16.mxu1 %v2122_v7 }
0x1355   :  { %v798_v61 = vpop.permute.xlu0 %797 }
0x1356   :  { %1872 = vmatmul.mubr.msk.bf16.vlgmr.msra.gmra.mrb[16].mxu0 %vm92_vm0, %v798_v61 }
0x1357   :  { %1882 = vmatpush3.bf16.msra.mxu1 %v2384_v31  ;;  %1896 = vmatpush3.bf16.msra.mxu0 %v2377_v59 }
0x1358   :  { %1887 = vmatprep.subr.bf16.mxu1 %v2122_v7  ;;  %1897 = vmatprep.subr.bf16.mxu0 %v2122_v7 }
0x1359   :  { %v958_v16 = vpop.permute.xlu0 %957 }
0x135a   :  { %1884 = vmatmul.mubr.msk.bf16.vlgmr.msra.gmra.mrb[24].mxu1 %vm92_vm0, %v892_v62 }
0x135b   :  { %1888 = vmatpush3.bf16.msra.mxu1 %v2377_v59  ;;  %1891 = vmatprep.mubr.msk.bf16.mxu1 %vm2123_vm1, %v2122_v7 }
0x135c   :  { %1889 = vmatprep.subr.bf16.mxu1 %v2122_v7  ;;  %1898 = vmatpush3.bf16.msra.mxu0 %v2384_v31 }
0x135d   :  { %1911 = vmatprep.subr.bf16.mxu0 %v2122_v7 }
0x135f   :  { %1890 = vmatpush3.bf16.msra.mxu1 %v2384_v31 }
0x1360   :  { %1903 = vmatprep.subr.bf16.mxu1 %v2122_v7 }
0x1425   :  { %v728_v63 = vpop.f32.mrb[20].mxu1 }
0x1426   :  { %v734_v0 = vadd.f32 %v728_v63, %v2247_v21  ;;  %v1865_v1 = vpop.f32.mrb[21].mxu1 }
0x1427   :  { %v731_v2 = vpop.f32.mrb[22].mxu1 }
0x1428   :  { %v1866_v4 = vpop.f32.mrb[23].mxu1  ;;  %v1681_v35 = vmul.f32 -1.442695, %v734_v0 }
0x1429   :  { %v2412_v5 = vpop.f32.mrb[16].mxu0 }
0x142a   :  { %v861_v9 = vpop.f32.mrb[17].mxu0 }
0x142b   :  { %v862_v11 = vadd.f32 %v2410_v18, %v861_v9  ;;  %v2415_v12 = vpop.f32.mrb[18].mxu0 }
0x142c   :  { %v864_v13 = vpop.f32.mrb[19].mxu0 }
0x142d   :  { %v942_v15 = vpop.f32.mrb[24].mxu1  ;;  %v865_v52 = vadd.f32 %v2410_v18, %v864_v13 }
0x142e   :  { %v948_v17 = vadd.f32 %v942_v15, %v862_v11  ;;  %v1885_v19 = vpop.f32.mrb[25].mxu1 }
0x142f   :  { %v945_v21 = vpop.f32.mrb[26].mxu1 }
0x1430   :  { %2034 = vtanh.f32 %v948_v17  ;;  %v1886_v20 = vpop.f32.mrb[27].mxu1  ;;  %v1701_v6 = vmul.f32 -1.442695, %v948_v17 }
0x1432   :  { %2036 = vpow2.f32 %v1701_v6 }
0x143a   :  { %v2035_v22 = vpop.eup %2034 }
0x143b   :  { %962 = vrot.lane.b32.xlu1 %v2035_v22, %s2124_s12  ;;  %v870_v22 = vadd.f32 %v2412_v5, %v2410_v18 }
0x143c   :  { %v2037_v24 = vpop.eup %2036 }
0x143d   :  { %v952_v26 = vadd.f32 1.0, %v2037_v24 }
0x143f   :  { %2038 = vrcp.f32 %v952_v26 }
0x1449   :  { %v2039_v27 = vpop.eup %2038 }
0x144a   :  { %v960_v29 = vmul.f32 %v2039_v27, %v958_v16 }
0x14ad   :  { %v963_v28 = vpop.permute.xlu1 %962 }
0x14ae   :  { %v965_v8 = vmul.f32 %v2039_v27, %v963_v28 }
0x14b0   :  { %967 = vrot.lane.b32.xlu1 %v965_v8, %s2125_s15 }
0x1522   :  { %v968_v25 = vpop.permute.xlu1 %967 }
0x1523   :  { %v970_v30 = vadd.f32 %v968_v25, %v960_v29 }
0x1525   :  { %2040 = vtanh.f32 %v970_v30 }
0x1526   :  { %2042 = vtanh.f32 %v734_v0 }
0x1527   :  { %2044 = vpow2.f32 %v1681_v35 }
0x152f   :  { %v2041_v32 = vpop.eup %2040 }
0x1530   :  { %973 = vrot.lane.b32.xlu0 %v2041_v32, %s2124_s12  ;;  %v2043_v34 = vpop.eup %2042 }
0x1531   :  { %v2045_v36 = vpop.eup %2044 }
0x1532   :  { %v738_v37 = vadd.f32 1.0, %v2045_v36 }
0x1534   :  { %744 = vrot.lane.b32.xlu0 %v2043_v34, %s2124_s12  ;;  %2046 = vrcp.f32 %v738_v37 }
0x153e   :  { %v2047_v41 = vpop.eup %2046 }
0x153f   :  { %v742_v45 = vmul.f32 %v2047_v41, %v2347_v14 }
0x15a2   :  { %v974_v38 = vpop.permute.xlu0 %973 }
0x15a3   :  { %v2421_v39 = vmul.f32 %v2039_v27, %v974_v38 }
0x15a5   :  { %v977_v40 = vpack.c.bf16 %v2421_v39, %v2421_v39 }
0x15a6   :  { %v745_v42 = vpop.permute.xlu0 %744 }
0x15a7   :  { %v747_v43 = vmul.f32 %v2047_v41, %v745_v42  ;;  %979 = vrot.lane.b32.xlu1 %v977_v40, %s2125_s15 }
0x15a9   :  { %749 = vrot.lane.b32.xlu0 %v747_v43, %s2125_s15  ;;  %v873_v43 = vadd.f32 %v2415_v12, %v2410_v18 }
0x1619   :  { %v980_v44 = vpop.permute.xlu1 %979 }
0x161a   :  { %1892 = vmatmul.mubr.msk.bf16.vlgmr.msra.gmra.mrb[28].mxu1 %vm92_vm0, %v980_v44 }
0x161b   :  { %v750_v46 = vpop.permute.xlu0 %749  ;;  %1904 = vmatpush3.bf16.msra.mxu1 %v2377_v59  ;;  %1907 = vmatprep.mubr.msk.bf16.mxu1 %vm2123_vm1, %v2122_v7 }
0x161c   :  { %v2432_v48 = vadd.f32 %v750_v46, %v742_v45  ;;  %1905 = vmatprep.subr.bf16.mxu1 %v2122_v7 }
0x161e   :  { %2048 = vtanh.f32 %v2432_v48 }
0x161f   :  { %1906 = vmatpush3.bf16.msra.mxu1 %v2384_v31 }
0x1620   :  { %1919 = vmatprep.subr.bf16.mxu1 %v2122_v7 }
0x1628   :  { %v2049_v23 = vpop.eup %2048 }
0x1629   :  { %755 = vrot.lane.b32.xlu0 %v2049_v23, %s2124_s12 }
0x162d   :  { %799 = vrot.lane.b32.xlu0 %v771_v49, %s2125_s15 }
0x169b   :  { %v756_v14 = vpop.permute.xlu0 %755 }
0x169c   :  { %v2446_v1 = vmul.f32 %v2047_v41, %v756_v14 }
0x169e   :  { %v772_v4 = vpack.c.bf16 %v2446_v1, %v2361_v56 }
0x169f   :  { %v800_v50 = vpop.permute.xlu0 %799 }
0x16a0   :  { %1875 = vmatprep.mubr.msk.bf16.mxu0 %vm92_vm0, %v800_v50 }
0x16ed   :  { %v1018_v53 = vpop.f32.mrb[28].mxu1 }
0x16ee   :  { %v1024_v54 = vadd.f32 %v1018_v53, %v865_v52  ;;  %v1893_v55 = vpop.f32.mrb[29].mxu1 }
0x16ef   :  { %v1021_v57 = vpop.f32.mrb[30].mxu1 }
0x16f0   :  { %2050 = vtanh.f32 %v1024_v54  ;;  %v1894_v58 = vpop.f32.mrb[31].mxu1  ;;  %v1703_v3 = vmul.f32 -1.442695, %v1024_v54 }
0x16f2   :  { %2052 = vpow2.f32 %v1703_v3 }
0x16fa   :  { %v2051_v47 = vpop.eup %2050 }
0x16fb   :  { %1034 = vrot.lane.b32.xlu1 %v2051_v47, %s2124_s12 }
0x16fc   :  { %v2053_v10 = vpop.eup %2052 }
0x16fd   :  { %v1028_v33 = vadd.f32 1.0, %v2053_v10 }
0x16ff   :  { %2054 = vrcp.f32 %v1028_v33 }
0x1709   :  { %v2055_v60 = vpop.eup %2054 }
0x170a   :  { %v1032_v62 = vmul.f32 %v2055_v60, %v970_v30 }
0x176d   :  { %v1035_v51 = vpop.permute.xlu1 %1034 }
0x176e   :  { %v1037_v61 = vmul.f32 %v2055_v60, %v1035_v51 }
0x1770   :  { %1039 = vrot.lane.b32.xlu1 %v1037_v61, %s2125_s15 }
0x17e2   :  { %v1040_v63 = vpop.permute.xlu1 %1039 }
0x17e3   :  { %v1042_v0 = vadd.f32 %v1040_v63, %v1032_v62 }
0x17e5   :  { %2056 = vtanh.f32 %v1042_v0 }
0x17ef   :  { %v2057_v2 = vpop.eup %2056 }
0x17f0   :  { %1045 = vrot.lane.b32.xlu1 %v2057_v2, %s2124_s12 }
0x17f4   :  { %801 = vrot.lane.b32.xlu1 %v772_v4, %s2125_s15 }
0x1862   :  { %v1046_v9 = vpop.permute.xlu1 %1045 }
0x1863   :  { %v2452_v11 = vmul.f32 %v2055_v60, %v1046_v9 }
0x1865   :  { %v1049_v13 = vpack.c.bf16 %v2452_v11, %v2452_v11 }
0x1866   :  { %v802_v15 = vpop.permute.xlu1 %801 }
0x1867   :  { %1051 = vrot.lane.b32.xlu0 %v1049_v13, %s2125_s15  ;;  %1876 = vmatmul.mubr.msk.bf16.gmra.mrb[20].mxu0 %vm92_vm0, %v802_v15 }
0x1868   :  { %1899 = vmatprep.mubr.msk.bf16.mxu0 %vm2123_vm1, %v2122_v7 }
0x18d9   :  { %v1052_v17 = vpop.permute.xlu0 %1051 }
0x18da   :  { %1900 = vmatmul.mubr.msk.bf16.vlgmr.msra.gmra.mrb[24].mxu0 %vm92_vm0, %v1052_v17 }
0x18db   :  { %1912 = vmatpush3.bf16.msra.mxu0 %v2377_v59  ;;  %1915 = vmatprep.mubr.msk.bf16.mxu0 %vm2123_vm1, %v2122_v7 }
0x18dc   :  { %1913 = vmatprep.subr.bf16.mxu0 %v2122_v7 }
0x18df   :  { %1914 = vmatpush3.bf16.msra.mxu0 %v2384_v31 }
0x18e0   :  { %1927 = vmatprep.subr.bf16.mxu0 %v2122_v7 }
0x193a   :  { %v2467_v56 = vpop.f32.mrb[20].mxu0 }
0x193b   :  { %v2469_v19 = vpop.f32.mrb[21].mxu0 }
0x193c   :  { %v2471_v21 = vpop.f32.mrb[22].mxu0  ;;  %v878_v61 = vadd.f32 %v2410_v18, %v2469_v19 }
0x193d   :  { %v2473_v20 = vpop.f32.mrb[23].mxu0 }
0x19ad   :  { %v1090_v6 = vpop.f32.mrb[24].mxu0 }
0x19ae   :  { %v1096_v24 = vadd.f32 %v1090_v6, %v870_v22  ;;  %v1901_v26 = vpop.f32.mrb[25].mxu0 }
0x19af   :  { %v1093_v27 = vpop.f32.mrb[26].mxu0 }
0x19b0   :  { %2058 = vtanh.f32 %v1096_v24  ;;  %v1902_v28 = vpop.f32.mrb[27].mxu0  ;;  %v1705_v16 = vmul.f32 -1.442695, %v1096_v24 }
0x19b2   :  { %2060 = vpow2.f32 %v1705_v16 }
0x19ba   :  { %v2059_v8 = vpop.eup %2058 }
0x19bb   :  { %1106 = vrot.lane.b32.xlu1 %v2059_v8, %s2124_s12 }
0x19bc   :  { %v2061_v29 = vpop.eup %2060 }
0x19bd   :  { %v1100_v25 = vadd.f32 1.0, %v2061_v29 }
0x19bf   :  { %2062 = vrcp.f32 %v1100_v25 }
0x19c9   :  { %v2063_v30 = vpop.eup %2062 }
0x19ca   :  { %v1104_v5 = vmul.f32 %v2063_v30, %v1042_v0 }
0x1a2d   :  { %v1107_v32 = vpop.permute.xlu1 %1106 }
0x1a2e   :  { %v1109_v34 = vmul.f32 %v2063_v30, %v1107_v32 }
0x1a30   :  { %1111 = vrot.lane.b32.xlu0 %v1109_v34, %s2125_s15 }
0x1aa2   :  { %v1112_v35 = vpop.permute.xlu0 %1111 }
0x1aa3   :  { %v1114_v36 = vadd.f32 %v1112_v35, %v1104_v5 }
0x1aa5   :  { %2064 = vtanh.f32 %v1114_v36 }
0x1aaf   :  { %v2065_v37 = vpop.eup %2064 }
0x1ab0   :  { %1117 = vrot.lane.b32.xlu1 %v2065_v37, %s2124_s12 }
0x1b22   :  { %v1118_v38 = vpop.permute.xlu1 %1117 }
0x1b23   :  { %v2480_v40 = vmul.f32 %v2063_v30, %v1118_v38  ;;  %v881_v30 = vadd.f32 %v2410_v18, %v2473_v20 }
0x1b25   :  { %v1121_v41 = vpack.c.bf16 %v2480_v40, %v2480_v40 }
0x1b27   :  { %1123 = vrot.lane.b32.xlu0 %v1121_v41, %s2125_s15 }
0x1b99   :  { %v1124_v42 = vpop.permute.xlu0 %1123 }
0x1b9a   :  { %1908 = vmatmul.mubr.msk.bf16.vlgmr.msra.gmra.mrb[32].mxu1 %vm92_vm0, %v1124_v42 }
0x1b9b   :  { %1920 = vmatpush3.bf16.msra.mxu1 %v2377_v59  ;;  %1923 = vmatprep.mubr.msk.bf16.mxu1 %vm2123_vm1, %v2122_v7 }
0x1b9c   :  { %1921 = vmatprep.subr.bf16.mxu1 %v2122_v7 }
0x1b9f   :  { %1922 = vmatpush3.bf16.msra.mxu1 %v2384_v31 }
0x1ba0   :  { %1935 = vmatprep.subr.bf16.mxu1 %v2122_v7 }
0x1c6d   :  { %v1162_v44 = vpop.f32.mrb[32].mxu1 }
0x1c6e   :  { %v1168_v45 = vadd.f32 %v1162_v44, %v873_v43  ;;  %v1909_v46 = vpop.f32.mrb[33].mxu1 }
0x1c6f   :  { %v1165_v23 = vpop.f32.mrb[34].mxu1 }
0x1c70   :  { %2066 = vtanh.f32 %v1168_v45  ;;  %v1910_v49 = vpop.f32.mrb[35].mxu1  ;;  %v1707_v50 = vmul.f32 -1.442695, %v1168_v45 }
0x1c72   :  { %2068 = vpow2.f32 %v1707_v50  ;;  %v886_v50 = vadd.f32 %v2467_v56, %v2410_v18 }
0x1c7a   :  { %v2067_v14 = vpop.eup %2066 }
0x1c7b   :  { %1178 = vrot.lane.b32.xlu1 %v2067_v14, %s2124_s12 }
0x1c7c   :  { %v2069_v52 = vpop.eup %2068 }
0x1c7d   :  { %v1172_v53 = vadd.f32 1.0, %v2069_v52 }
0x1c7f   :  { %2070 = vrcp.f32 %v1172_v53 }
0x1c89   :  { %v2071_v54 = vpop.eup %2070 }
0x1c8a   :  { %v1176_v12 = vmul.f32 %v2071_v54, %v1114_v36 }
0x1ced   :  { %v1179_v55 = vpop.permute.xlu1 %1178 }
0x1cee   :  { %v1181_v57 = vmul.f32 %v2071_v54, %v1179_v55 }
0x1cf0   :  { %1183 = vrot.lane.b32.xlu0 %v1181_v57, %s2125_s15 }
0x1d62   :  { %v1184_v58 = vpop.permute.xlu0 %1183 }
0x1d63   :  { %v1186_v47 = vadd.f32 %v1184_v58, %v1176_v12 }
0x1d65   :  { %2072 = vtanh.f32 %v1186_v47 }
0x1d6f   :  { %v2073_v3 = vpop.eup %2072 }
0x1d70   :  { %1189 = vrot.lane.b32.xlu1 %v2073_v3, %s2124_s12 }
0x1de2   :  { %v1190_v10 = vpop.permute.xlu1 %1189 }
0x1de3   :  { %v2497_v33 = vmul.f32 %v2071_v54, %v1190_v10 }
0x1de5   :  { %v1193_v60 = vpack.c.bf16 %v2497_v33, %v2497_v33 }
0x1de7   :  { %1195 = vrot.lane.b32.xlu0 %v1193_v60, %s2125_s15 }
0x1e59   :  { %v1196_v51 = vpop.permute.xlu0 %1195 }
0x1e5a   :  { %1916 = vmatmul.mubr.msk.bf16.vlgmr.msra.gmra.mrb[28].mxu0 %vm92_vm0, %v1196_v51 }
0x1e5b   :  { %1928 = vmatpush3.bf16.msra.mxu0 %v2377_v59  ;;  %1931 = vmatprep.mubr.msk.bf16.mxu0 %vm2123_vm1, %v2122_v7 }
0x1e5c   :  { %1929 = vmatprep.subr.bf16.mxu0 %v2122_v7 }
0x1e5f   :  { %1930 = vmatpush3.bf16.msra.mxu0 %v2384_v31 }
0x1f2d   :  { %v1234_v62 = vpop.f32.mrb[28].mxu0 }
0x1f2e   :  { %v1240_v63 = vadd.f32 %v1234_v62, %v878_v61  ;;  %v1917_v0 = vpop.f32.mrb[29].mxu0 }
0x1f2f   :  { %v1237_v2 = vpop.f32.mrb[30].mxu0 }
0x1f30   :  { %2074 = vtanh.f32 %v1240_v63  ;;  %v1918_v4 = vpop.f32.mrb[31].mxu0  ;;  %v1709_v13 = vmul.f32 -1.442695, %v1240_v63 }
0x1f32   :  { %2076 = vpow2.f32 %v1709_v13  ;;  %v889_v13 = vadd.f32 %v2471_v21, %v2410_v18  ;;  %v1493_v18 = vpack.c.bf16 %v2452_v11, %v2421_v39  ;;  %v1976_v21 = vld [vmem:[%s2615_s6] sm:$0xff]   ;;  %v1977_v39 = vld [vmem:[%s2615_s6 + $0x8] sm:$0xff]   ;;  %s2126_s6 = smov 96  }
0x1f33   :  { %1943 = vmatprep.subr.bf16.mxu0 %v1976_v21 }
0x1f3a   :  { %v2075_v9 = vpop.eup %2074 }
0x1f3b   :  { %1250 = vrot.lane.b32.xlu1 %v2075_v9, %s2124_s12 }
0x1f3c   :  { %v2077_v15 = vpop.eup %2076 }
0x1f3d   :  { %v1244_v17 = vadd.f32 1.0, %v2077_v15 }
0x1f3f   :  { %2078 = vrcp.f32 %v1244_v17 }
0x1f49   :  { %v2079_v22 = vpop.eup %2078 }
0x1f4a   :  { %v1248_v19 = vmul.f32 %v2079_v22, %v1186_v47 }
0x1fad   :  { %v1251_v6 = vpop.permute.xlu1 %1250 }
0x1fae   :  { %v1253_v24 = vmul.f32 %v2079_v22, %v1251_v6 }
0x1fb0   :  { %1255 = vrot.lane.b32.xlu0 %v1253_v24, %s2125_s15 }
0x2022   :  { %v1256_v26 = vpop.permute.xlu0 %1255 }
0x2023   :  { %v1258_v27 = vadd.f32 %v1256_v26, %v1248_v19 }
0x2025   :  { %2080 = vtanh.f32 %v1258_v27 }
0x202f   :  { %v2081_v28 = vpop.eup %2080 }
0x2030   :  { %1261 = vrot.lane.b32.xlu1 %v2081_v28, %s2124_s12 }
0x20a2   :  { %v1262_v8 = vpop.permute.xlu1 %1261 }
0x20a3   :  { %v2513_v16 = vmul.f32 %v2079_v22, %v1262_v8 }
0x20a5   :  { %v1265_v29 = vpack.c.bf16 %v2513_v16, %v2513_v16 }
0x20a7   :  { %1267 = vrot.lane.b32.xlu0 %v1265_v29, %s2125_s15 }
0x2119   :  { %v1268_v25 = vpop.permute.xlu0 %1267 }
0x211a   :  { %1924 = vmatmul.mubr.msk.bf16.vlgmr.msra.gmra.mrb[36].mxu1 %vm92_vm0, %v1268_v25 }
0x211b   :  { %1936 = vmatpush3.bf16.msra.mxu1 %v2377_v59  ;;  %1939 = vmatprep.mubr.msk.bf16.mxu1 %vm2123_vm1, %v2122_v7 }
0x211c   :  { %1937 = vmatprep.subr.bf16.mxu1 %v2122_v7 }
0x211f   :  { %1938 = vmatpush3.bf16.msra.mxu1 %v2384_v31 }
0x21ed   :  { %v1306_v32 = vpop.f32.mrb[36].mxu1 }
0x21ee   :  { %v1312_v34 = vadd.f32 %v1306_v32, %v881_v30  ;;  %v1925_v5 = vpop.f32.mrb[37].mxu1 }
0x21ef   :  { %v1309_v35 = vpop.f32.mrb[38].mxu1 }
0x21f0   :  { %2082 = vtanh.f32 %v1312_v34  ;;  %v1926_v36 = vpop.f32.mrb[39].mxu1  ;;  %v1711_v59 = vmul.f32 -1.442695, %v1312_v34 }
0x21f2   :  { %2084 = vpow2.f32 %v1711_v59 }
0x21fa   :  { %v2083_v37 = vpop.eup %2082 }
0x21fb   :  { %1322 = vrot.lane.b32.xlu1 %v2083_v37, %s2124_s12 }
0x21fc   :  { %v2085_v38 = vpop.eup %2084 }
0x21fd   :  { %v1316_v41 = vadd.f32 1.0, %v2085_v38 }
0x21ff   :  { %2086 = vrcp.f32 %v1316_v41 }
0x2209   :  { %v2087_v7 = vpop.eup %2086 }
0x220a   :  { %v1320_v20 = vmul.f32 %v2087_v7, %v1258_v27 }
0x226d   :  { %v1323_v42 = vpop.permute.xlu1 %1322 }
0x226e   :  { %v1325_v31 = vmul.f32 %v2087_v7, %v1323_v42 }
0x2270   :  { %1327 = vrot.lane.b32.xlu0 %v1325_v31, %s2125_s15 }
0x22e2   :  { %v1328_v43 = vpop.permute.xlu0 %1327 }
0x22e3   :  { %v1330_v44 = vadd.f32 %v1328_v43, %v1320_v20 }
0x22e5   :  { %2088 = vtanh.f32 %v1330_v44 }
0x22ef   :  { %v2089_v45 = vpop.eup %2088 }
0x22f0   :  { %1333 = vrot.lane.b32.xlu1 %v2089_v45, %s2124_s12 }
0x2362   :  { %v1334_v46 = vpop.permute.xlu1 %1333 }
0x2363   :  { %v1336_v23 = vmul.f32 %v2087_v7, %v1334_v46 }
0x2365   :  { %v1337_v49 = vpack.c.bf16 %v1336_v23, %v1336_v23  ;;  %v1495_v30 = vpack.c.bf16 %v1336_v23, %v2513_v16 }
0x2367   :  { %1339 = vrot.lane.b32.xlu0 %v1337_v49, %s2125_s15 }
0x23d9   :  { %v1340_v14 = vpop.permute.xlu0 %1339 }
0x23da   :  { %1932 = vmatmul.mubr.msk.bf16.vlgmr.msra.gmra.mrb[32].mxu0 %vm92_vm0, %v1340_v14 }
0x23db   :  { %1944 = vmatpush3.bf16.msra.mxu0 %v1976_v21 }
0x23dc   :  { %1945 = vmatprep.subr.bf16.mxu0 %v1977_v39 }
0x23df   :  { %1946 = vmatpush3.bf16.msra.mxu0 %v1977_v39 }
0x24ad   :  { %v1378_v52 = vpop.f32.mrb[32].mxu0 }
0x24ae   :  { %v1384_v53 = vadd.f32 %v1378_v52, %v886_v50  ;;  %v1933_v54 = vpop.f32.mrb[33].mxu0 }
0x24af   :  { %v1381_v55 = vpop.f32.mrb[34].mxu0 }
0x24b0   :  { %2090 = vtanh.f32 %v1384_v53  ;;  %v1934_v57 = vpop.f32.mrb[35].mxu0  ;;  %v1713_v58 = vmul.f32 -1.442695, %v1384_v53 }
0x24b2   :  { %2092 = vpow2.f32 %v1713_v58 }
0x24ba   :  { %v2091_v12 = vpop.eup %2090 }
0x24bb   :  { %1394 = vrot.lane.b32.xlu1 %v2091_v12, %s2124_s12 }
0x24bc   :  { %v2093_v47 = vpop.eup %2092 }
0x24bd   :  { %v1388_v3 = vadd.f32 1.0, %v2093_v47 }
0x24bf   :  { %2094 = vrcp.f32 %v1388_v3 }
0x24c9   :  { %v2095_v10 = vpop.eup %2094 }
0x24ca   :  { %v1392_v56 = vmul.f32 %v2095_v10, %v1330_v44 }
0x252d   :  { %v1395_v60 = vpop.permute.xlu1 %1394 }
0x252e   :  { %v1397_v51 = vmul.f32 %v2095_v10, %v1395_v60 }
0x2530   :  { %1399 = vrot.lane.b32.xlu0 %v1397_v51, %s2125_s15 }
0x25a2   :  { %v1400_v61 = vpop.permute.xlu0 %1399 }
0x25a3   :  { %v1402_v62 = vadd.f32 %v1400_v61, %v1392_v56 }
0x25a5   :  { %2096 = vtanh.f32 %v1402_v62 }
0x25af   :  { %v2097_v63 = vpop.eup %2096 }
0x25b0   :  { %1405 = vrot.lane.b32.xlu1 %v2097_v63, %s2124_s12 }
0x2622   :  { %v1406_v0 = vpop.permute.xlu1 %1405 }
0x2623   :  { %v1408_v2 = vmul.f32 %v2095_v10, %v1406_v0 }
0x2625   :  { %v1409_v4 = vpack.c.bf16 %v1408_v2, %v1408_v2 }
0x2627   :  { %1411 = vrot.lane.b32.xlu0 %v1409_v4, %s2125_s15 }
0x2699   :  { %v1412_v9 = vpop.permute.xlu0 %1411 }
0x269a   :  { %1940 = vmatmul.mubr.msk.bf16.vlgmr.msra.gmra.mrb[40].mxu1 %vm92_vm0, %v1412_v9 }
0x276d   :  { %v1450_v15 = vpop.f32.mrb[40].mxu1 }
0x276e   :  { %v1456_v17 = vadd.f32 %v1450_v15, %v889_v13  ;;  %v1941_v22 = vpop.f32.mrb[41].mxu1 }
0x276f   :  { %v1453_v6 = vpop.f32.mrb[42].mxu1 }
0x2770   :  { %2098 = vtanh.f32 %v1456_v17  ;;  %v1942_v24 = vpop.f32.mrb[43].mxu1  ;;  %v1715_v26 = vmul.f32 -1.442695, %v1456_v17 }
0x2772   :  { %2100 = vpow2.f32 %v1715_v26 }
0x277a   :  { %v2099_v19 = vpop.eup %2098 }
0x277b   :  { %1466 = vrot.lane.b32.xlu1 %v2099_v19, %s2124_s12 }
0x277c   :  { %v2101_v27 = vpop.eup %2100 }
0x277d   :  { %v1460_v28 = vadd.f32 1.0, %v2101_v27 }
0x277f   :  { %2102 = vrcp.f32 %v1460_v28 }
0x2789   :  { %v2103_v8 = vpop.eup %2102 }
0x278a   :  { %v1464_v32 = vmul.f32 %v2103_v8, %v1402_v62 }
0x27ed   :  { %v1467_v29 = vpop.permute.xlu1 %1466 }
0x27ee   :  { %v1469_v25 = vmul.f32 %v2103_v8, %v1467_v29 }
0x27f0   :  { %1471 = vrot.lane.b32.xlu0 %v1469_v25, %s2125_s15 }
0x27f4   :  { %1512 = vrot.lane.b32.xlu0 %v1493_v18, %s2125_s15 }
0x27f8   :  { %1516 = vrot.lane.b32.xlu0 %v1495_v30, %s2125_s15 }
0x27fc   :  { %760 = vrot.lane.b32.xlu0 %v2446_v1, %s2125_s15  ;;  %v1494_v1 = vpack.c.bf16 %v2497_v33, %v2480_v40 }
0x2862   :  { %v1472_v11 = vpop.permute.xlu0 %1471 }
0x2863   :  { %v1474_v34 = vadd.f32 %v1472_v11, %v1464_v32 }
0x2865   :  { %2104 = vtanh.f32 %v1474_v34 }
0x2866   :  { %v1513_v5 = vpop.permute.xlu0 %1512 }
0x2867   :  { %1947 = vmatprep.mubr.msk.bf16.mxu0 %vm92_vm0, %v1513_v5 }
0x286a   :  { %v1517_v16 = vpop.permute.xlu0 %1516 }
0x286e   :  { %v761_v35 = vpop.permute.xlu0 %760 }
0x286f   :  { %v2105_v36 = vpop.eup %2104  ;;  %763 = vst.msk [vmem:[%s2616_s9] sm:$0xff] %vm92_vm0, %v761_v35 }
0x2870   :  { %1477 = vrot.lane.b32.xlu1 %v2105_v36, %s2124_s12 }
0x2874   :  { %1514 = vrot.lane.b32.xlu1 %v1494_v1, %s2125_s15 }
0x28e2   :  { %v1478_v37 = vpop.permute.xlu1 %1477 }
0x28e3   :  { %v1480_v59 = vmul.f32 %v2103_v8, %v1478_v37 }
0x28e5   :  { %v1496_v38 = vpack.c.bf16 %v1480_v59, %v1408_v2  ;;  %1482 = vrot.lane.b32.xlu0 %v1480_v59, %s2125_s15 }
0x28e6   :  { %v1515_v41 = vpop.permute.xlu1 %1514 }
0x28e7   :  { %1518 = vrot.lane.b32.xlu1 %v1496_v38, %s2125_s15  ;;  %1948 = vmatmul.mubr.msk.bf16.vlgmr.msra.gmra.mrb[36].mxu0 %vm92_vm0, %v1515_v41 }
0x28e8   :  { %1951 = vmatprep.mubr.msk.bf16.mxu0 %vm92_vm0, %v1517_v16 }
0x28eb   :  { %765 = vrot.lane.b32.xlu1 %v2432_v48, %s2126_s6  ;;  %v1718_v48 = vld [vmem:[%s2618_s7] ss:$0 sm:$0xff] }
0x28ef   :  { %1488 = vrot.lane.b32.xlu1 %v1474_v34, %s2126_s6 }
0x2957   :  { %v1483_v7 = vpop.permute.xlu0 %1482 }
0x2958   :  { %1716 = vst.msk [vmem:[%s2616_s9 + $0x8] sm:$0xff] %vm92_vm0, %v1483_v7 }
0x2959   :  { %v1519_v40 = vpop.permute.xlu1 %1518 }
0x295a   :  { %1952 = vmatmul.mubr.msk.bf16.gmra.mrb[40].mxu0 %vm92_vm0, %v1519_v40 }
0x295d   :  { %v766_v33 = vpop.permute.xlu1 %765 }
0x295e   :  { %768 = vst.msk [vmem:[%s2617_s10] sm:$0xff] %vm92_vm0, %v766_v33 }
0x2961   :  { %v1489_v42 = vpop.permute.xlu1 %1488 }
0x2962   :  { %1717 = vst.msk [vmem:[%s2617_s10 + $0x8] sm:$0xff] %vm92_vm0, %v1489_v42 }
0x29ba   :  { %v1949_v31 = vpop.f32.mrb[36].mxu0 }
0x29bb   :  { %v1587_v20 = vadd.f32 %v1949_v31, %v1718_v48  ;;  %v1578_v43 = vpop.f32.mrb[37].mxu0 }
0x29bc   :  { %v1579_v44 = vadd.f32 %v1718_v48, %v1578_v43  ;;  %v1950_v45 = vpop.f32.mrb[38].mxu0 }
0x29bd   :  { %v1613_v46 = vmul.f32 1.442695, %v1587_v20  ;;  %v1590_v23 = vadd.f32 %v1950_v45, %v1718_v48  ;;  %v1581_v49 = vpop.f32.mrb[39].mxu0 }
0x29be   :  { %v1609_v14 = vmul.f32 1.442695, %v1579_v44  ;;  %v1582_v50 = vadd.f32 %v1718_v48, %v1581_v49 }
0x29bf   :  { %2106 = vpow2.f32 %v1613_v46  ;;  %v1615_v52 = vmul.f32 1.442695, %v1590_v23 }
0x29c0   :  { %2108 = vpow2.f32 %v1609_v14  ;;  %v1611_v53 = vmul.f32 1.442695, %v1582_v50 }
0x29c1   :  { %2110 = vpow2.f32 %v1615_v52 }
0x29c2   :  { %2112 = vpow2.f32 %v1611_v53 }
0x29c9   :  { %v2107_v54 = vpop.eup %2106 }
0x29ca   :  { %v2109_v55 = vpop.eup %2108  ;;  %v1627_v57 = vsub.f32 0.0, %v2107_v54 }
0x29cb   :  { %v2111_v12 = vpop.eup %2110  ;;  %v1625_v58 = vsub.f32 0.0, %v2109_v55 }
0x29cc   :  { %v2113_v47 = vpop.eup %2112  ;;  %1635 = vst [vmem:[%s2619_s8 + $0x10] sm:$0xff] %v1627_v57  ;;  %v1628_v3 = vsub.f32 0.0, %v2111_v12 }
0x29cd   :  { %1633 = vst [vmem:[%s2619_s8] sm:$0xff] %v1625_v58  ;;  %v1626_v10 = vsub.f32 0.0, %v2113_v47 }
0x29ce   :  { %1636 = vst [vmem:[%s2619_s8 + $0x18] sm:$0xff] %v1628_v3 }
0x29cf   :  { %1634 = vst [vmem:[%s2619_s8 + $0x8] sm:$0xff] %v1626_v10 }
0x2a2d   :  { %v1953_v60 = vpop.f32.mrb[40].mxu0 }
0x2a2e   :  { %v1603_v51 = vadd.f32 %v1953_v60, %v1718_v48  ;;  %v1594_v56 = vpop.f32.mrb[41].mxu0 }
0x2a2f   :  { %v1595_v61 = vadd.f32 %v1718_v48, %v1594_v56  ;;  %v1954_v62 = vpop.f32.mrb[42].mxu0 }
0x2a30   :  { %v1621_v63 = vmul.f32 1.442695, %v1603_v51  ;;  %v1606_v0 = vadd.f32 %v1954_v62, %v1718_v48  ;;  %v1597_v2 = vpop.f32.mrb[43].mxu0 }
0x2a31   :  { %v1617_v4 = vmul.f32 1.442695, %v1595_v61  ;;  %v1598_v9 = vadd.f32 %v1718_v48, %v1597_v2 }
0x2a32   :  { %2114 = vpow2.f32 %v1621_v63  ;;  %v1623_v13 = vmul.f32 1.442695, %v1606_v0 }
0x2a33   :  { %2116 = vpow2.f32 %v1617_v4  ;;  %v1619_v15 = vmul.f32 1.442695, %v1598_v9 }
0x2a34   :  { %2118 = vpow2.f32 %v1623_v13 }
0x2a35   :  { %2120 = vpow2.f32 %v1619_v15 }
0x2a3c   :  { %v2115_v17 = vpop.eup %2114 }
0x2a3d   :  { %v2117_v22 = vpop.eup %2116  ;;  %v1631_v6 = vsub.f32 0.0, %v2115_v17 }
0x2a3e   :  { %v2119_v24 = vpop.eup %2118  ;;  %v1629_v19 = vsub.f32 0.0, %v2117_v22 }
0x2a3f   :  { %v2121_v26 = vpop.eup %2120  ;;  %1639 = vst [vmem:[%s2619_s8 + $0x30] sm:$0xff] %v1631_v6  ;;  %v1632_v27 = vsub.f32 0.0, %v2119_v24 }
0x2a40   :  { %1637 = vst [vmem:[%s2619_s8 + $0x20] sm:$0xff] %v1629_v19  ;;  %v1630_v28 = vsub.f32 0.0, %v2121_v26 }
0x2a41   :  { %1640 = vst [vmem:[%s2619_s8 + $0x38] sm:$0xff] %v1632_v27 }
0x2a42   :  { %1638 = vst [vmem:[%s2619_s8 + $0x28] sm:$0xff] %v1630_v28 }

</bundles_post_ra>
